<compile_context>
chip_gen: v7x
topology: tpu7x:2x2x1
jax: 0.10.0
libtpu: 0.0.40
codegen_flags: <defaults>
</compile_context>

<pallas_src>
import functools

import jax
import jax.numpy as jnp
from jax.experimental import pallas as pl
from jax.experimental.pallas import tpu as pltpu

_LANES = 128
_KC = 3                    # conv kernel size
_NTAP = _KC * _KC          # 9 conv2 taps


# ---------------------------------------------------------------------------
# Fused Pallas kernel: conv1 + conv2 + fc/tanh + q1 head, one batch block/step
# ---------------------------------------------------------------------------

def _fused_critic_kernel(p_ref, pa_ref, w1_ref, w2_ref, wfc_ref, wh_ref,
                         wq_ref, bias_ref, o_ref, *, npos, bblk):
    """One batch block per grid step; everything downstream of the streamed
    patches lives in VMEM / vregs.

    p_ref  : (1, npos*bblk, 9*kpatch+1) rows ordered (position, batch); the
             last lane is 1.0 so the conv1 bias rides inside w1.
    pa_ref : (bblk, prop+act+1) with a trailing ones lane (head bias row).
    """
    ch = w2_ref.shape[1]
    feat_dim = wfc_ref.shape[1]

    bias = bias_ref[...]                       # (3, 128)
    b_conv2 = bias[0:1, 0:ch]                  # (1, ch)
    b_fc = bias[1:2, 0:feat_dim]               # (1, feat_dim)
    b_q = bias[2:3, :]                         # (1, 128)

    # conv1: all 9 conv2 taps at once through a block-diagonal weight; the
    # result is already lane-concatenated per tap (lane t*ch + c).
    p2d = p_ref[0]                                                        # (npos*bblk, 325)
    y1 = jnp.maximum(
        jnp.dot(p2d, w1_ref[...], preferred_element_type=jnp.float32), 0.0)  # (npos*bblk, 9*ch)

    # conv2: one matmul over the 9 concatenated taps.
    y2 = jnp.maximum(
        jnp.dot(y1, w2_ref[...], preferred_element_type=jnp.float32) + b_conv2,
        0.0)                                                              # (npos*bblk, ch)

    # Flatten (position, channel) into lanes once, then fc + tanh on the MXU.
    y2_flat = jnp.concatenate(
        [y2[p * bblk:(p + 1) * bblk, :] for p in range(npos)], axis=-1)   # (bblk, npos*ch)
    feat = jnp.tanh(
        jnp.dot(y2_flat, wfc_ref[...], preferred_element_type=jnp.float32)
        + b_fc)                                                           # (bblk, feat_dim)

    # q1 head only (ModelWrapper discards q2): one matmul over [feat, prop, act, 1].
    x_head = jnp.concatenate([feat, pa_ref[...]], axis=-1)                # (bblk, feat+prop+act+1)
    h = jnp.maximum(
        jnp.dot(x_head, wh_ref[...], preferred_element_type=jnp.float32), 0.0)  # (bblk, hid)

    # Lane- and sublane-dense final store: wq / b_q are zero-padded to 128 lanes.
    o_ref[...] = (jnp.dot(h, wq_ref[...], preferred_element_type=jnp.float32)
                  + b_q)                                                  # (bblk, 128)


# ---------------------------------------------------------------------------
# Wrapper-side glue (pure static slicing / weight rearrangement, fused by XLA)
# ---------------------------------------------------------------------------

def _build_tap_patches(x_nhwc):
    """P[p, b, :] = the 9 conv1 im2col patches (tap-major) feeding conv2 output
    position p, plus a trailing 1.0 lane (conv1 bias column)."""
    B, H, W, C = x_nhwc.shape
    oh1, ow1 = (H - _KC) // 2 + 1, (W - _KC) // 2 + 1
    oh2, ow2 = oh1 - (_KC - 1), ow1 - (_KC - 1)
    cols = []
    for ki in range(_KC):
        for kj in range(_KC):
            cols.append(x_nhwc[:, ki:ki + 2 * oh1:2, kj:kj + 2 * ow1:2, :])
    p1 = jnp.concatenate(cols, axis=-1)                    # (B, oh1, ow1, 9*C)
    taps = []
    for di in range(_KC):
        for dj in range(_KC):
            taps.append(p1[:, di:di + oh2, dj:dj + ow2, :])
    pt = jnp.concatenate(taps, axis=-1)                    # (B, oh2, ow2, 9*9*C)
    npos = oh2 * ow2
    pt = pt.reshape(B, npos, _NTAP * _KC * _KC * C)
    pt = jnp.concatenate([pt, jnp.ones((B, npos, 1), pt.dtype)], axis=-1)
    return jnp.transpose(pt, (1, 0, 2)), npos              # (npos, B, 9*kpatch+1)


def _prepare_weights(p):
    """Static weight rearrangements (constant-folded under jit)."""
    w1, b1 = p["w_conv1"], p["b_conv1"]                    # (kpatch, ch), (1, ch)
    ch = w1.shape[1]
    zeros = jnp.zeros_like(w1)
    rows = []
    for t in range(_NTAP):                                 # block-diagonal conv1 weight
        rows.append(jnp.concatenate(
            [zeros] * t + [w1] + [zeros] * (_NTAP - 1 - t), axis=1))
    w1_diag = jnp.concatenate(rows, axis=0)                # (9*kpatch, 9*ch)
    w1_aug = jnp.concatenate([w1_diag, jnp.tile(b1, (1, _NTAP))], axis=0)  # + bias row

    # fused q1 head weight acting on [feat, prop, act, 1]
    wh_aug = jnp.concatenate(
        [p["q1_w1f"], p["q1_w1p"], p["q1_w1a"], p["q1_b1"]], axis=0)

    wq = jnp.pad(p["q1_w2"], ((0, 0), (0, _LANES - p["q1_w2"].shape[1])))  # (hid, 128)

    feat_dim = p["w_fc"].shape[1]
    bias_slab = jnp.zeros((3, _LANES), jnp.float32)
    bias_slab = bias_slab.at[0, :ch].set(p["b_conv2"][0])
    bias_slab = bias_slab.at[1, :feat_dim].set(p["b_fc"][0])
    bias_slab = bias_slab.at[2, :p["q1_b2"].shape[1]].set(p["q1_b2"][0])

    return w1_aug, p["w_conv2"], p["w_fc"], wh_aug, wq, bias_slab


def _choose_batch_block(batch):
    """>= 8 sublane rows per step; >= 2 grid steps when the batch allows it (so
    both v7x TensorCores get work); capped at 128 f32 rows to keep the
    double-buffered patch block far below v7x's 64 MiB VMEM."""
    if batch <= 8:
        return 8
    half = -(-batch // 2)
    return max(8, min(128, ((half + 7) // 8) * 8))


def model_wrapper_forward(obs_nchw, propris, action, params):
    """Equivalent of ModelWrapper.forward(obs) = model(obs, propris, action)[0]."""
    B = obs_nchw.shape[0]
    x = jnp.transpose(obs_nchw, (0, 2, 3, 1))              # NCHW -> NHWC
    P, npos = _build_tap_patches(x)                        # (npos, B, k1)
    k1 = P.shape[-1]

    bblk = _choose_batch_block(B)
    nblk = -(-B // bblk)
    bpad = nblk * bblk

    # Pad batch, then pre-block so each grid step reads one contiguous
    # (npos*bblk, k1) slab with rows ordered (position, batch-within-block).
    P = jnp.pad(P, ((0, 0), (0, bpad - B), (0, 0)))
    P = (P.reshape(npos, nblk, bblk, k1).transpose(1, 0, 2, 3)
          .reshape(nblk, npos * bblk, k1))

    pa = jnp.concatenate(
        [propris, action, jnp.ones((B, 1), propris.dtype)], axis=-1)
    pa = jnp.pad(pa, ((0, bpad - B), (0, 0)))              # (bpad, prop+act+1)

    weights = _prepare_weights(params)

    in_specs = [
        pl.BlockSpec((1, npos * bblk, k1), lambda i: (i, 0, 0)),
        pl.BlockSpec((bblk, pa.shape[-1]), lambda i: (i, 0)),
    ] + [pl.BlockSpec(w.shape, lambda i, nd=w.ndim: (0,) * nd) for w in weights]

    out = pl.pallas_call(
        functools.partial(_fused_critic_kernel, npos=npos, bblk=bblk),
        grid=(nblk,),
        out_shape=jax.ShapeDtypeStruct((bpad, _LANES), jnp.float32),
        in_specs=in_specs,
        out_specs=pl.BlockSpec((bblk, _LANES), lambda i: (i, 0)),
        compiler_params=pltpu.CompilerParams(
            dimension_semantics=("parallel",)),            # batch blocks over v7x's 2 TCs
    )(P, pa, *weights)

    return out[:B, :1]                                     # (B, 1) == q1


# ---------------------------------------------------------------------------
# Pure-JAX reference (matches the original im2col formulation)
# ---------------------------------------------------------------------------

def _im2col(x_nhwc, kh, kw, stride):
    B, H, W, C = x_nhwc.shape
    oh = (H - kh) // stride + 1
    ow = (W - kw) // stride + 1
    cols = []
    for i in range(kh):
        for j in range(kw):
            cols.append(x_nhwc[:, i:i + stride * oh:stride,
                               j:j + stride * ow:stride, :])
    patches = jnp.concatenate(cols, axis=-1)
    return patches.reshape(B * oh * ow, kh * kw * C), oh, ow


def _reference(obs_nchw, propris, action, p):
    x = jnp.transpose(obs_nchw, (0, 2, 3, 1))
    B = x.shape[0]
    patches1, oh1, ow1 = _im2col(x, 3, 3, 2)
    y1 = jnp.maximum(patches1 @ p["w_conv1"] + p["b_conv1"], 0.0)
    y1 = y1.reshape(B, oh1, ow1, -1)
    patches2, _, _ = _im2col(y1, 3, 3, 1)
    y2 = jnp.maximum(patches2 @ p["w_conv2"] + p["b_conv2"], 0.0)
    flat = y2.reshape(B, -1)
    feat = jnp.tanh(flat @ p["w_fc"] + p["b_fc"])
    h = jnp.maximum(feat @ p["q1_w1f"] + propris @ p["q1_w1p"]
                    + action @ p["q1_w1a"] + p["q1_b1"], 0.0)
    return h @ p["q1_w2"] + p["q1_b2"]


# ---------------------------------------------------------------------------
# Deterministic parameter construction
# ---------------------------------------------------------------------------

def init_params(key, cin, prop_dim, act_dim, H, W, feat_dim=32, hid=64, ch=8):
    ks = iter(jax.random.split(key, 32))
    f32 = jnp.float32

    def w(shape, scale=0.1):
        return (scale * jax.random.normal(next(ks), shape)).astype(f32)

    oh1 = (H - 3) // 2 + 1
    ow1 = (W - 3) // 2 + 1
    oh2, ow2 = oh1 - 2, ow1 - 2
    flat_dim = oh2 * ow2 * ch
    p = {
        "w_conv1": w((3 * 3 * cin, ch)), "b_conv1": w((1, ch)),
        "w_conv2": w((3 * 3 * ch, ch)), "b_conv2": w((1, ch)),
        "w_fc": w((flat_dim, feat_dim)), "b_fc": w((1, feat_dim)),
    }
    # The underlying critic has two heads; ModelWrapper only returns q1, so the
    # fused kernel never touches the q2_* parameters (dead work removed).
    for name in ("q1", "q2"):
        p[f"{name}_w1f"] = w((feat_dim, hid))
        p[f"{name}_w1p"] = w((prop_dim, hid))
        p[f"{name}_w1a"] = w((act_dim, hid))
        p[f"{name}_b1"] = w((1, hid))
        p[f"{name}_w2"] = w((hid, 1))
        p[f"{name}_b2"] = w((1, 1))
    return p


# ---------------------------------------------------------------------------

if __name__ == "__main__":
    B, C, H, W = 2, 4, 16, 16
    PROP, ACT = 6, 3

    key = jax.random.PRNGKey(0)
    k_obs, k_prop, k_act, k_par = jax.random.split(key, 4)

    obs = jax.random.normal(k_obs, (B, C, H, W), dtype=jnp.float32)   # NCHW
    propris = jax.random.normal(k_prop, (B, PROP), dtype=jnp.float32)
    action = jax.random.normal(k_act, (B, ACT), dtype=jnp.float32)
    params = init_params(k_par, C, PROP, ACT, H, W)

    fwd = jax.jit(functools.partial(model_wrapper_forward, params=params))
    q1 = fwd(obs, propris, action)
    jax.block_until_ready(q1)

    ref = _reference(obs, propris, action, params)
    assert q1.shape == (B, 1), q1.shape
    # MXU reassociation / rounding differs from the pure-VPU reference path.
    assert jnp.allclose(q1, ref, atol=1e-3, rtol=1e-3), (q1, ref)

    print("KERNEL_OK")
</pallas_src>

<mosaic_0001>
module attributes {stable_mosaic.version = 11 : i64} {
  func.func @_fused_critic_kernel(%arg0: i32, %arg1: memref<1x200x325xf32, #tpu.memory_space<vmem>>, %arg2: memref<8x10xf32, #tpu.memory_space<vmem>>, %arg3: memref<325x72xf32, #tpu.memory_space<vmem>>, %arg4: memref<72x8xf32, #tpu.memory_space<vmem>>, %arg5: memref<200x32xf32, #tpu.memory_space<vmem>>, %arg6: memref<42x64xf32, #tpu.memory_space<vmem>>, %arg7: memref<64x128xf32, #tpu.memory_space<vmem>>, %arg8: memref<3x128xf32, #tpu.memory_space<vmem>>, %arg9: memref<8x128xf32, #tpu.memory_space<vmem>>) attributes {dimension_semantics = [#tpu.dimension_semantics<parallel>], iteration_bounds = array<i64: 1>, scalar_prefetch = 0 : i64, scratch_operands = 0 : i64, tpu.core_type = #tpu.core_type<tc>, window_params = [{transform_indices = @transform_0, window_bounds = array<i64: 1, 200, 325>}, {transform_indices = @transform_1, window_bounds = array<i64: 8, 10>}, {pipeline_mode = #tpu.pipeline_mode<synchronous>, transform_indices = @transform_2, window_bounds = array<i64: 325, 72>}, {pipeline_mode = #tpu.pipeline_mode<synchronous>, transform_indices = @transform_3, window_bounds = array<i64: 72, 8>}, {pipeline_mode = #tpu.pipeline_mode<synchronous>, transform_indices = @transform_4, window_bounds = array<i64: 200, 32>}, {pipeline_mode = #tpu.pipeline_mode<synchronous>, transform_indices = @transform_5, window_bounds = array<i64: 42, 64>}, {pipeline_mode = #tpu.pipeline_mode<synchronous>, transform_indices = @transform_6, window_bounds = array<i64: 64, 128>}, {pipeline_mode = #tpu.pipeline_mode<synchronous>, transform_indices = @transform_7, window_bounds = array<i64: 3, 128>}, {transform_indices = @transform_8, window_bounds = array<i64: 8, 128>}]} {
    %c0 = arith.constant 0 : index
    %c0_0 = arith.constant 0 : index
    %0 = vector.load %arg8[%c0, %c0_0] : memref<3x128xf32, #tpu.memory_space<vmem>>, vector<3x128xf32>
    %1 = vector.extract_strided_slice %0 {offsets = [0, 0], sizes = [1, 8], strides = [1, 1]} : vector<3x128xf32> to vector<1x8xf32>
    %2 = vector.extract_strided_slice %0 {offsets = [1, 0], sizes = [1, 32], strides = [1, 1]} : vector<3x128xf32> to vector<1x32xf32>
    %3 = vector.extract_strided_slice %0 {offsets = [2, 0], sizes = [1, 128], strides = [1, 1]} : vector<3x128xf32> to vector<1x128xf32>
    %c0_1 = arith.constant 0 : index
    %c0_2 = arith.constant 0 : index
    %c0_3 = arith.constant 0 : index
    %4 = vector.load %arg1[%c0_1, %c0_2, %c0_3] : memref<1x200x325xf32, #tpu.memory_space<vmem>>, vector<1x200x325xf32>
    %5 = vector.shape_cast %4 : vector<1x200x325xf32> to vector<200x325xf32>
    %c0_4 = arith.constant 0 : index
    %c0_5 = arith.constant 0 : index
    %6 = vector.load %arg3[%c0_4, %c0_5] : memref<325x72xf32, #tpu.memory_space<vmem>>, vector<325x72xf32>
    %cst = arith.constant dense<0.000000e+00> : vector<200x72xf32>
    %7 = tpu.matmul %5, %6, %cst {dimension_numbers = #tpu.dot_dimension_numbers<[1], [0], [0], [1], [0, 0, 1, 1], [], []>} : vector<200x325xf32>, vector<325x72xf32>, vector<200x72xf32> -> vector<200x72xf32>
    %cst_6 = arith.constant 0.000000e+00 : f32
    %8 = vector.broadcast %cst_6 : f32 to vector<200x72xf32>
    %9 = arith.maximumf %7, %8 : vector<200x72xf32>
    %c0_7 = arith.constant 0 : index
    %c0_8 = arith.constant 0 : index
    %10 = vector.load %arg4[%c0_7, %c0_8] : memref<72x8xf32, #tpu.memory_space<vmem>>, vector<72x8xf32>
    %cst_9 = arith.constant dense<0.000000e+00> : vector<200x8xf32>
    %11 = tpu.matmul %9, %10, %cst_9 {dimension_numbers = #tpu.dot_dimension_numbers<[1], [0], [0], [1], [0, 0, 1, 1], [], []>} : vector<200x72xf32>, vector<72x8xf32>, vector<200x8xf32> -> vector<200x8xf32>
    %12 = vector.broadcast %1 : vector<1x8xf32> to vector<200x8xf32>
    %13 = arith.addf %11, %12 : vector<200x8xf32>
    %cst_10 = arith.constant 0.000000e+00 : f32
    %14 = vector.broadcast %cst_10 : f32 to vector<200x8xf32>
    %15 = arith.maximumf %13, %14 : vector<200x8xf32>
    %16 = vector.extract_strided_slice %15 {offsets = [0, 0], sizes = [8, 8], strides = [1, 1]} : vector<200x8xf32> to vector<8x8xf32>
    %17 = vector.extract_strided_slice %15 {offsets = [8, 0], sizes = [8, 8], strides = [1, 1]} : vector<200x8xf32> to vector<8x8xf32>
    %18 = vector.extract_strided_slice %15 {offsets = [16, 0], sizes = [8, 8], strides = [1, 1]} : vector<200x8xf32> to vector<8x8xf32>
    %19 = vector.extract_strided_slice %15 {offsets = [24, 0], sizes = [8, 8], strides = [1, 1]} : vector<200x8xf32> to vector<8x8xf32>
    %20 = vector.extract_strided_slice %15 {offsets = [32, 0], sizes = [8, 8], strides = [1, 1]} : vector<200x8xf32> to vector<8x8xf32>
    %21 = vector.extract_strided_slice %15 {offsets = [40, 0], sizes = [8, 8], strides = [1, 1]} : vector<200x8xf32> to vector<8x8xf32>
    %22 = vector.extract_strided_slice %15 {offsets = [48, 0], sizes = [8, 8], strides = [1, 1]} : vector<200x8xf32> to vector<8x8xf32>
    %23 = vector.extract_strided_slice %15 {offsets = [56, 0], sizes = [8, 8], strides = [1, 1]} : vector<200x8xf32> to vector<8x8xf32>
    %24 = vector.extract_strided_slice %15 {offsets = [64, 0], sizes = [8, 8], strides = [1, 1]} : vector<200x8xf32> to vector<8x8xf32>
    %25 = vector.extract_strided_slice %15 {offsets = [72, 0], sizes = [8, 8], strides = [1, 1]} : vector<200x8xf32> to vector<8x8xf32>
    %26 = vector.extract_strided_slice %15 {offsets = [80, 0], sizes = [8, 8], strides = [1, 1]} : vector<200x8xf32> to vector<8x8xf32>
    %27 = vector.extract_strided_slice %15 {offsets = [88, 0], sizes = [8, 8], strides = [1, 1]} : vector<200x8xf32> to vector<8x8xf32>
    %28 = vector.extract_strided_slice %15 {offsets = [96, 0], sizes = [8, 8], strides = [1, 1]} : vector<200x8xf32> to vector<8x8xf32>
    %29 = vector.extract_strided_slice %15 {offsets = [104, 0], sizes = [8, 8], strides = [1, 1]} : vector<200x8xf32> to vector<8x8xf32>
    %30 = vector.extract_strided_slice %15 {offsets = [112, 0], sizes = [8, 8], strides = [1, 1]} : vector<200x8xf32> to vector<8x8xf32>
    %31 = vector.extract_strided_slice %15 {offsets = [120, 0], sizes = [8, 8], strides = [1, 1]} : vector<200x8xf32> to vector<8x8xf32>
    %32 = vector.extract_strided_slice %15 {offsets = [128, 0], sizes = [8, 8], strides = [1, 1]} : vector<200x8xf32> to vector<8x8xf32>
    %33 = vector.extract_strided_slice %15 {offsets = [136, 0], sizes = [8, 8], strides = [1, 1]} : vector<200x8xf32> to vector<8x8xf32>
    %34 = vector.extract_strided_slice %15 {offsets = [144, 0], sizes = [8, 8], strides = [1, 1]} : vector<200x8xf32> to vector<8x8xf32>
    %35 = vector.extract_strided_slice %15 {offsets = [152, 0], sizes = [8, 8], strides = [1, 1]} : vector<200x8xf32> to vector<8x8xf32>
    %36 = vector.extract_strided_slice %15 {offsets = [160, 0], sizes = [8, 8], strides = [1, 1]} : vector<200x8xf32> to vector<8x8xf32>
    %37 = vector.extract_strided_slice %15 {offsets = [168, 0], sizes = [8, 8], strides = [1, 1]} : vector<200x8xf32> to vector<8x8xf32>
    %38 = vector.extract_strided_slice %15 {offsets = [176, 0], sizes = [8, 8], strides = [1, 1]} : vector<200x8xf32> to vector<8x8xf32>
    %39 = vector.extract_strided_slice %15 {offsets = [184, 0], sizes = [8, 8], strides = [1, 1]} : vector<200x8xf32> to vector<8x8xf32>
    %40 = vector.extract_strided_slice %15 {offsets = [192, 0], sizes = [8, 8], strides = [1, 1]} : vector<200x8xf32> to vector<8x8xf32>
    %41 = tpu.concatenate %16, %17, %18, %19, %20, %21, %22, %23, %24, %25, %26, %27, %28, %29, %30, %31 in 1 : vector<8x8xf32>, vector<8x8xf32>, vector<8x8xf32>, vector<8x8xf32>, vector<8x8xf32>, vector<8x8xf32>, vector<8x8xf32>, vector<8x8xf32>, vector<8x8xf32>, vector<8x8xf32>, vector<8x8xf32>, vector<8x8xf32>, vector<8x8xf32>, vector<8x8xf32>, vector<8x8xf32>, vector<8x8xf32> -> vector<8x128xf32>
    %42 = tpu.concatenate %32, %33, %34, %35, %36, %37, %38, %39, %40 in 1 : vector<8x8xf32>, vector<8x8xf32>, vector<8x8xf32>, vector<8x8xf32>, vector<8x8xf32>, vector<8x8xf32>, vector<8x8xf32>, vector<8x8xf32>, vector<8x8xf32> -> vector<8x72xf32>
    %43 = tpu.concatenate %41, %42 in 1 : vector<8x128xf32>, vector<8x72xf32> -> vector<8x200xf32>
    %c0_11 = arith.constant 0 : index
    %c0_12 = arith.constant 0 : index
    %44 = vector.load %arg5[%c0_11, %c0_12] : memref<200x32xf32, #tpu.memory_space<vmem>>, vector<200x32xf32>
    %cst_13 = arith.constant dense<0.000000e+00> : vector<8x32xf32>
    %45 = tpu.matmul %43, %44, %cst_13 {dimension_numbers = #tpu.dot_dimension_numbers<[1], [0], [0], [1], [0, 0, 1, 1], [], []>} : vector<8x200xf32>, vector<200x32xf32>, vector<8x32xf32> -> vector<8x32xf32>
    %46 = vector.broadcast %2 : vector<1x32xf32> to vector<8x32xf32>
    %47 = arith.addf %45, %46 : vector<8x32xf32>
    %48 = math.tanh %47 : vector<8x32xf32>
    %c0_14 = arith.constant 0 : index
    %c0_15 = arith.constant 0 : index
    %49 = vector.load %arg2[%c0_14, %c0_15] : memref<8x10xf32, #tpu.memory_space<vmem>>, vector<8x10xf32>
    %50 = tpu.concatenate %48, %49 in 1 : vector<8x32xf32>, vector<8x10xf32> -> vector<8x42xf32>
    %c0_16 = arith.constant 0 : index
    %c0_17 = arith.constant 0 : index
    %51 = vector.load %arg6[%c0_16, %c0_17] : memref<42x64xf32, #tpu.memory_space<vmem>>, vector<42x64xf32>
    %cst_18 = arith.constant dense<0.000000e+00> : vector<8x64xf32>
    %52 = tpu.matmul %50, %51, %cst_18 {dimension_numbers = #tpu.dot_dimension_numbers<[1], [0], [0], [1], [0, 0, 1, 1], [], []>} : vector<8x42xf32>, vector<42x64xf32>, vector<8x64xf32> -> vector<8x64xf32>
    %cst_19 = arith.constant 0.000000e+00 : f32
    %53 = vector.broadcast %cst_19 : f32 to vector<8x64xf32>
    %54 = arith.maximumf %52, %53 : vector<8x64xf32>
    %c0_20 = arith.constant 0 : index
    %c0_21 = arith.constant 0 : index
    %55 = vector.load %arg7[%c0_20, %c0_21] : memref<64x128xf32, #tpu.memory_space<vmem>>, vector<64x128xf32>
    %cst_22 = arith.constant dense<0.000000e+00> : vector<8x128xf32>
    %56 = tpu.matmul %54, %55, %cst_22 {dimension_numbers = #tpu.dot_dimension_numbers<[1], [0], [0], [1], [0, 0, 1, 1], [], []>} : vector<8x64xf32>, vector<64x128xf32>, vector<8x128xf32> -> vector<8x128xf32>
    %57 = vector.broadcast %3 : vector<1x128xf32> to vector<8x128xf32>
    %58 = arith.addf %56, %57 : vector<8x128xf32>
    %c0_23 = arith.constant 0 : index
    %c0_24 = arith.constant 0 : index
    %59 = vector.load %arg9[%c0_23, %c0_24] : memref<8x128xf32, #tpu.memory_space<vmem>>, vector<8x128xf32>
    tpu.vector_store %arg9[%c0_23, %c0_24], %58 {strides = array<i32>} : memref<8x128xf32, #tpu.memory_space<vmem>>, vector<8x128xf32>,
    return
  }
  func.func @transform_0(%arg0: i32) -> (i32, i32, i32) {
    %c0_i32 = arith.constant 0 : i32
    %c0_i32_0 = arith.constant 0 : i32
    %c0_i32_1 = arith.constant 0 : i32
    return %arg0, %c0_i32, %c0_i32_0 : i32, i32, i32
  }
  func.func @transform_1(%arg0: i32) -> (i32, i32) {
    %c0_i32 = arith.constant 0 : i32
    %c0_i32_0 = arith.constant 0 : i32
    return %arg0, %c0_i32 : i32, i32
  }
  func.func @transform_2(%arg0: i32) -> (i32, i32) {
    %c0_i32 = arith.constant 0 : i32
    %c0_i32_0 = arith.constant 0 : i32
    %c0_i32_1 = arith.constant 0 : i32
    return %c0_i32, %c0_i32_0 : i32, i32
  }
  func.func @transform_3(%arg0: i32) -> (i32, i32) {
    %c0_i32 = arith.constant 0 : i32
    %c0_i32_0 = arith.constant 0 : i32
    %c0_i32_1 = arith.constant 0 : i32
    return %c0_i32, %c0_i32_0 : i32, i32
  }
  func.func @transform_4(%arg0: i32) -> (i32, i32) {
    %c0_i32 = arith.constant 0 : i32
    %c0_i32_0 = arith.constant 0 : i32
    %c0_i32_1 = arith.constant 0 : i32
    return %c0_i32, %c0_i32_0 : i32, i32
  }
  func.func @transform_5(%arg0: i32) -> (i32, i32) {
    %c0_i32 = arith.constant 0 : i32
    %c0_i32_0 = arith.constant 0 : i32
    %c0_i32_1 = arith.constant 0 : i32
    return %c0_i32, %c0_i32_0 : i32, i32
  }
  func.func @transform_6(%arg0: i32) -> (i32, i32) {
    %c0_i32 = arith.constant 0 : i32
    %c0_i32_0 = arith.constant 0 : i32
    %c0_i32_1 = arith.constant 0 : i32
    return %c0_i32, %c0_i32_0 : i32, i32
  }
  func.func @transform_7(%arg0: i32) -> (i32, i32) {
    %c0_i32 = arith.constant 0 : i32
    %c0_i32_0 = arith.constant 0 : i32
    %c0_i32_1 = arith.constant 0 : i32
    return %c0_i32, %c0_i32_0 : i32, i32
  }
  func.func @transform_8(%arg0: i32) -> (i32, i32) {
    %c0_i32 = arith.constant 0 : i32
    %c0_i32_0 = arith.constant 0 : i32
    return %arg0, %c0_i32 : i32, i32
  }
}

</mosaic_0001>

<bundles_post_ra>
// kernel: model_wrapper_forward.1
= control target key start
LH: loop header
LB: loop body
LE: loop exit
PB: predicated region body
PF: predicated region fallthrough
CT: control target
= control target key end

     0   :  { %v1904_v0 = vmov 0.0|0.0   ;;  %vm1905_vm0 = vmmov 0   ;;  %v1906_v6 = vmov 0.0   ;;  %vm222_vm1 = vcmask 1044480   ;;  %s1909_s21 = smov 24   ;;  %s1910_s26 = smov 32   ;;  %s2818_s2 = inlined_call_operand.vmem [shape: f32[325,72], index: 2, kind: input, shape index: {}]   ;;  %s2819_s0 = inlined_call_operand.vmem [shape: f32[1,200,325], index: 0, kind: input, shape index: {}]   ;;  %s2820_s3 = inlined_call_operand.vmem [shape: f32[72,8], index: 3, kind: input, shape index: {}]   ;;  %s2821_s4 = inlined_call_operand.vmem [shape: f32[200,32], index: 4, kind: input, shape index: {}]   ;;  %s2822_s7 = inlined_call_operand.vmem [shape: f32[3,128], index: 7, kind: input, shape index: {}]   ;;  %s2823_s1 = inlined_call_operand.vmem [shape: f32[8,10], index: 1, kind: input, shape index: {}]   ;;  %s2824_s5 = inlined_call_operand.vmem [shape: f32[42,64], index: 5, kind: input, shape index: {}]   ;;  %s2825_s6 = inlined_call_operand.vmem [shape: f32[64,128], index: 6, kind: input, shape index: {}]   ;;  %s2826_s8 = inlined_call_operand.vmem [shape: f32[8,128], index: 8, kind: output, shape index: {}]  }
   0x1   :  { %1707 = vmatprep.subr.bf16.mxu0 %v1904_v0  ;;  %v105_v1 = vld [vmem:[%s2818_s2] sm:$0xff]  ;;  %v106_v2 = vld [vmem:[%s2818_s2 + $0x8] sm:$0xff]  ;;  %v107_v3 = vld [vmem:[%s2818_s2 + $0x10] sm:$0xff]  ;;  %1837 = vmatprep.subr.bf16.mxu1 %v1904_v0  ;;  %vm146_vm2 = vcmask 564224   ;;  %vm644_vm3 = vcmask 588800   ;;  %s1912_s9 = smov 48  }
   0x2   :  { %v1708_v4 = vpack.c.bf16 %v106_v2, %v105_v1  ;;  %v108_v5 = vld [vmem:[%s2818_s2 + $0x18] sm:$0xff]  ;;  %1538 = vmatprep.mubr.msk.f32.mxu1 %vm1905_vm0, %v1906_v6  ;;  %v109_v8 = vld [vmem:[%s2818_s2 + $0x20] sm:$0xff]  ;;  %v110_v9 = vld [vmem:[%s2818_s2 + $0x28] sm:$0xff]  ;;  %s1913_s10 = smov 56   ;;  %s1914_s15 = smov 64   ;;  %vm995_vm4 = vcmask 64512  }
   0x3   :  { %v1711_v7 = vpack.c.bf16 %v108_v5, %v107_v3  ;;  %v1714_v10 = vpack.c.bf16 %v110_v9, %v109_v8  ;;  %v111_v11 = vld [vmem:[%s2818_s2 + $0x30] sm:$0xff]  ;;  %v112_v12 = vld [vmem:[%s2818_s2 + $0x38] sm:$0xff]  ;;  %v31_v13 = vld [vmem:[%s2819_s0 + $0x8] sm:$0xff]  ;;  %s1915_s16 = smov 72   ;;  %s1916_s20 = smov 80   ;;  %vm997_vm5 = vcmask 130048  }
   0x4   :  { %1709 = vmatpush1.bf16.msra.mxu0 %v1708_v4  ;;  %v1717_v14 = vpack.c.bf16 %v112_v12, %v111_v11  ;;  %290 = vmatprep.mubr.f32.mxu0 %v31_v13  ;;  %v137_v15 = vld [vmem:[%s2818_s2 + $0x100] sm:$0xff]  ;;  %v138_v16 = vld [vmem:[%s2818_s2 + $0x108] sm:$0xff]  ;;  %v139_v21 = vld [vmem:[%s2818_s2 + $0x110] sm:$0xff]  ;;  %s1917_s22 = smov 88   ;;  %s1918_s28 = smov 96   ;;  %vm999_vm6 = vcmask 195584  }
   0x5   :  { %1710 = vmatprep.subr.bf16.mxu0 %v1904_v0  ;;  %v113_v17 = vld [vmem:[%s2818_s2 + $0x40] sm:$0xff]  ;;  %v114_v18 = vld [vmem:[%s2818_s2 + $0x48] sm:$0xff]  ;;  %v2014_v19 = vpack.c.bf16 %v138_v16, %v137_v15  ;;  %v140_v22 = vld [vmem:[%s2818_s2 + $0x118] sm:$0xff]  ;;  %s1919_s29 = smov 104   ;;  %s1920_s14 = smov 112   ;;  %vm1001_vm7 = vcmask 261120  }
   0x6   :  { %v1720_v20 = vpack.c.bf16 %v114_v18, %v113_v17  ;;  %v115_v23 = vld [vmem:[%s2818_s2 + $0x50] sm:$0xff]  ;;  %v116_v24 = vld [vmem:[%s2818_s2 + $0x58] sm:$0xff]  ;;  %v2031_v25 = vpack.c.bf16 %v140_v22, %v139_v21  ;;  %v141_v26 = vld [vmem:[%s2818_s2 + $0x120] sm:$0xff]  ;;  %vm1003_vm8 = vcmask 326656   ;;  %vm1005_vm9 = vcmask 392192  }
   0x7   :  { %1842 = vmatpush3.bf16.msra.mxu1 %v2014_v19  ;;  %v1723_v27 = vpack.c.bf16 %v116_v24, %v115_v23  ;;  %v117_v28 = vld [vmem:[%s2818_s2 + $0x60] sm:$0xff]  ;;  %v142_v29 = vld [vmem:[%s2818_s2 + $0x128] sm:$0xff]  ;;  %v143_v32 = vld [vmem:[%s2818_s2 + $0x130] sm:$0xff]  ;;  %vm1007_vm10 = vcmask 457728   ;;  %vm1009_vm11 = vcmask 523264   ;;  %vm1012_vm12 = vcmask 654336  }
   0x8   :  { %1712 = vmatpush1.bf16.msra.mxu0 %v1711_v7  ;;  %1838 = vmatprep.subr.bf16.mxu1 %v1904_v0  ;;  %v118_v30 = vld [vmem:[%s2818_s2 + $0x68] sm:$0xff]  ;;  %v2048_v31 = vpack.c.bf16 %v142_v29, %v141_v26  ;;  %v144_v33 = vld [vmem:[%s2818_s2 + $0x138] sm:$0xff]  ;;  %v119_v36 = vld [vmem:[%s2818_s2 + $0x70] sm:$0xff]  ;;  %vm1014_vm13 = vcmask 719872   ;;  %vm1016_vm14 = vcmask 785408   ;;  %vm1018_vm15 = vcmask 850944  }
   0x9   :  { %1713 = vmatprep.subr.bf16.mxu0 %v1904_v0  ;;  %v2057_v34 = vpack.c.bf16 %v144_v33, %v143_v32  ;;  %v1726_v35 = vpack.c.bf16 %v118_v30, %v117_v28  ;;  %v120_v37 = vld [vmem:[%s2818_s2 + $0x78] sm:$0xff]  ;;  %v2072_v39 = vld [vmem:[%s2818_s2 + $0x140] sm:$0x1f]  ;;  %v122_v41 = vld [vmem:[%s2818_s2 + $0x88] sm:$0xff] }
   0xa   :  { %v1729_v38 = vpack.c.bf16 %v120_v37, %v119_v36  ;;  %v121_v40 = vld [vmem:[%s2818_s2 + $0x80] sm:$0xff]  ;;  %v65_v42 = vld [vmem:[%s2819_s0 + $0x118] sm:$0xff]  ;;  %v123_v44 = vld [vmem:[%s2818_s2 + $0x90] sm:$0xff] }
   0xb   :  { %1843 = vmatpush3.bf16.msra.mxu1 %v2031_v25  ;;  %v1732_v43 = vpack.c.bf16 %v122_v41, %v121_v40  ;;  %v124_v45 = vld [vmem:[%s2818_s2 + $0x98] sm:$0xff]  ;;  %v68_v46 = vld [vmem:[%s2819_s0 + $0x130] sm:$0xff]  ;;  %v125_v48 = vld [vmem:[%s2818_s2 + $0xa0] sm:$0xff] }
   0xc   :  { %1715 = vmatpush1.bf16.msra.mxu0 %v1714_v10  ;;  %1839 = vmatprep.subr.bf16.mxu1 %v1904_v0  ;;  %v1735_v47 = vpack.c.bf16 %v124_v45, %v123_v44  ;;  %v126_v49 = vld [vmem:[%s2818_s2 + $0xa8] sm:$0xff]  ;;  %v127_v52 = vld [vmem:[%s2818_s2 + $0xb0] sm:$0xff]  ;;  %v128_v53 = vld [vmem:[%s2818_s2 + $0xb8] sm:$0xff] }
   0xd   :  { %1716 = vmatprep.subr.bf16.mxu0 %v1904_v0  ;;  %v71_v50 = vld [vmem:[%s2819_s0 + $0x148] sm:$0xff]  ;;  %v1738_v51 = vpack.c.bf16 %v126_v49, %v125_v48  ;;  %v74_v54 = vld [vmem:[%s2819_s0 + $0x160] sm:$0xff]  ;;  %v1741_v55 = vpack.c.bf16 %v128_v53, %v127_v52  ;;  %v77_v58 = vld [vmem:[%s2819_s0 + $0x178] sm:$0xff] }
   0xe   :  { %v129_v56 = vld [vmem:[%s2818_s2 + $0xc0] sm:$0xff]  ;;  %v130_v57 = vld [vmem:[%s2818_s2 + $0xc8] sm:$0xff]  ;;  %v131_v60 = vld [vmem:[%s2818_s2 + $0xd0] sm:$0xff] }
   0xf   :  { %1844 = vmatpush3.bf16.msra.mxu1 %v2048_v31  ;;  %v1744_v59 = vpack.c.bf16 %v130_v57, %v129_v56  ;;  %v132_v61 = vld [vmem:[%s2818_s2 + $0xd8] sm:$0xff]  ;;  %v80_v62 = vld [vmem:[%s2819_s0 + $0x190] sm:$0xff]  ;;  %v133_v1 = vld [vmem:[%s2818_s2 + $0xe0] sm:$0xff] }
  0x10   :  { %1718 = vmatpush1.bf16.msra.mxu0 %v1717_v14  ;;  %1840 = vmatprep.subr.bf16.mxu1 %v1904_v0  ;;  %v1747_v63 = vpack.c.bf16 %v132_v61, %v131_v60  ;;  %v134_v2 = vld [vmem:[%s2818_s2 + $0xe8] sm:$0xff]  ;;  %v135_v5 = vld [vmem:[%s2818_s2 + $0xf0] sm:$0xff]  ;;  %v136_v7 = vld [vmem:[%s2818_s2 + $0xf8] sm:$0xff] }
  0x11   :  { %1719 = vmatprep.subr.bf16.mxu0 %v1904_v0  ;;  %v83_v3 = vld [vmem:[%s2819_s0 + $0x1a8] sm:$0xff]  ;;  %v1750_v4 = vpack.c.bf16 %v134_v2, %v133_v1  ;;  %v86_v8 = vld [vmem:[%s2819_s0 + $0x1c0] sm:$0xff]  ;;  %v1753_v9 = vpack.c.bf16 %v136_v7, %v135_v5  ;;  %v89_v10 = vld [vmem:[%s2819_s0 + $0x1d8] sm:$0xff] }
  0x12   :  { %v30_v11 = vld [vmem:[%s2819_s0] sm:$0xff]  ;;  %v92_v13 = vld [vmem:[%s2819_s0 + $0x1f0] sm:$0xff]  ;;  %v33_v14 = vld [vmem:[%s2819_s0 + $0x18] sm:$0xff] }
  0x13   :  { %1845 = vmatpush3.bf16.msra.mxu1 %v2057_v34  ;;  %v34_v12 = vld [vmem:[%s2819_s0 + $0x20] sm:$0xff]  ;;  %v37_v15 = vld [vmem:[%s2819_s0 + $0x38] sm:$0xff]  ;;  %v95_v16 = vld [vmem:[%s2819_s0 + $0x208] sm:$0xff] }
  0x14   :  { %1721 = vmatpush1.bf16.msra.mxu0 %v1720_v20  ;;  %1841 = vmatprep.subr.mxu1 %v1906_v6  ;;  %v36_v17 = vld [vmem:[%s2819_s0 + $0x30] sm:$0xff]  ;;  %v39_v20 = vld [vmem:[%s2819_s0 + $0x48] sm:$0xff]  ;;  %v101_v22 = vld [vmem:[%s2819_s0 + $0x238] sm:$0xff] }
  0x15   :  { %1722 = vmatprep.subr.bf16.mxu0 %v1904_v0  ;;  %v40_v18 = vld [vmem:[%s2819_s0 + $0x50] sm:$0xff]  ;;  %v43_v21 = vld [vmem:[%s2819_s0 + $0x68] sm:$0xff]  ;;  %v42_v23 = vld [vmem:[%s2819_s0 + $0x60] sm:$0xff] }
  0x16   :  { %v46_v24 = vld [vmem:[%s2819_s0 + $0x80] sm:$0xff]  ;;  %v45_v26 = vld [vmem:[%s2819_s0 + $0x78] sm:$0xff]  ;;  %v48_v28 = vld [vmem:[%s2819_s0 + $0x90] sm:$0xff] }
  0x17   :  { %1846 = vmatpush3.msk.msra.mxu1 %vm222_vm1, %v2072_v39  ;;  %v52_v29 = vld [vmem:[%s2819_s0 + $0xb0] sm:$0xff]  ;;  %v51_v30 = vld [vmem:[%s2819_s0 + $0xa8] sm:$0xff]  ;;  %v54_v32 = vld [vmem:[%s2819_s0 + $0xc0] sm:$0xff] }
  0x18   :  { %1724 = vmatpush1.bf16.msra.mxu0 %v1723_v27  ;;  %1539 = vmatmul.mubr.msk.f32.vlgmr.msra.gmra.mrb[0].mxu1 %vm146_vm2, %v65_v42  ;;  %v49_v27 = vld [vmem:[%s2819_s0 + $0x98] sm:$0xff]  ;;  %v58_v33 = vld [vmem:[%s2819_s0 + $0xe0] sm:$0xff]  ;;  %v60_v36 = vld [vmem:[%s2819_s0 + $0xf0] sm:$0xff] }
  0x19   :  { %1725 = vmatprep.subr.bf16.mxu0 %v1904_v0  ;;  %1541 = vmatprep.mubr.msk.f32.mxu1 %vm1905_vm0, %v1906_v6  ;;  %v64_v37 = vld [vmem:[%s2819_s0 + $0x110] sm:$0xff]  ;;  %v66_v40 = vld [vmem:[%s2819_s0 + $0x120] sm:$0xff]  ;;  %v69_v42 = vld [vmem:[%s2819_s0 + $0x138] sm:$0xff] }
  0x1a   :  { %1767 = vmatprep.subr.bf16.mxu1 %v1904_v0  ;;  %v70_v41 = vld [vmem:[%s2819_s0 + $0x140] sm:$0xff]  ;;  %v72_v44 = vld [vmem:[%s2819_s0 + $0x150] sm:$0xff]  ;;  %v41_v5 = vld [vmem:[%s2819_s0 + $0x58] sm:$0xff] }
  0x1b   :  { %v76_v45 = vld [vmem:[%s2819_s0 + $0x170] sm:$0xff]  ;;  %v78_v48 = vld [vmem:[%s2819_s0 + $0x180] sm:$0xff] }
  0x1c   :  { %1727 = vmatpush1.bf16.msra.mxu0 %v1726_v35  ;;  %1542 = vmatmul.mubr.msk.f32.gmra.mrb[2].mxu1 %vm146_vm2, %v68_v46  ;;  %v61_v35 = vld [vmem:[%s2819_s0 + $0xf8] sm:$0xff]  ;;  %v75_v46 = vld [vmem:[%s2819_s0 + $0x168] sm:$0xff]  ;;  %v82_v49 = vld [vmem:[%s2819_s0 + $0x1a0] sm:$0xff] }
  0x1d   :  { %1728 = vmatprep.subr.bf16.mxu0 %v1904_v0  ;;  %1544 = vmatprep.mubr.msk.f32.mxu1 %vm1905_vm0, %v1906_v6  ;;  %v84_v52 = vld [vmem:[%s2819_s0 + $0x1b0] sm:$0xff]  ;;  %v90_v56 = vld [vmem:[%s2819_s0 + $0x1e0] sm:$0xff] }
  0x1e   :  { %v88_v53 = vld [vmem:[%s2819_s0 + $0x1d0] sm:$0xff]  ;;  %v94_v57 = vld [vmem:[%s2819_s0 + $0x200] sm:$0xff] }
  0x1f   :  { %v96_v60 = vld [vmem:[%s2819_s0 + $0x210] sm:$0xff]  ;;  %v102_v1 = vld [vmem:[%s2819_s0 + $0x240] sm:$0xff] }
  0x20   :  { %1730 = vmatpush1.bf16.msra.mxu0 %v1729_v38  ;;  %1545 = vmatmul.mubr.msk.f32.gmra.mrb[4].mxu1 %vm146_vm2, %v71_v50  ;;  %v63_v38 = vld [vmem:[%s2819_s0 + $0x108] sm:$0xff]  ;;  %v81_v50 = vld [vmem:[%s2819_s0 + $0x198] sm:$0xff]  ;;  %v100_v61 = vld [vmem:[%s2819_s0 + $0x230] sm:$0xff] }
  0x21   :  { %1731 = vmatprep.subr.bf16.mxu0 %v1904_v0  ;;  %1547 = vmatprep.mubr.msk.f32.mxu1 %vm1905_vm0, %v1906_v6  ;;  %v32_v2 = vld [vmem:[%s2819_s0 + $0x10] sm:$0xff] }
  0x22   :  { %v44_v7 = vld [vmem:[%s2819_s0 + $0x70] sm:$0xff] }
  0x24   :  { %1733 = vmatpush1.bf16.msra.mxu0 %v1732_v43  ;;  %1548 = vmatmul.mubr.msk.f32.gmra.mrb[6].mxu1 %vm146_vm2, %v74_v54  ;;  %v73_v43 = vld [vmem:[%s2819_s0 + $0x158] sm:$0xff]  ;;  %v87_v54 = vld [vmem:[%s2819_s0 + $0x1c8] sm:$0xff] }
  0x25   :  { %1734 = vmatprep.subr.bf16.mxu0 %v1904_v0  ;;  %1550 = vmatprep.mubr.msk.f32.mxu1 %vm1905_vm0, %v1906_v6 }
  0x28   :  { %1736 = vmatpush1.bf16.msra.mxu0 %v1735_v47  ;;  %1551 = vmatmul.mubr.msk.f32.gmra.mrb[8].mxu1 %vm146_vm2, %v77_v58  ;;  %v79_v47 = vld [vmem:[%s2819_s0 + $0x188] sm:$0xff]  ;;  %v93_v58 = vld [vmem:[%s2819_s0 + $0x1f8] sm:$0xff] }
  0x29   :  { %1737 = vmatprep.subr.bf16.mxu0 %v1904_v0  ;;  %1553 = vmatprep.mubr.msk.f32.mxu1 %vm1905_vm0, %v1906_v6 }
  0x2c   :  { %1739 = vmatpush1.bf16.msra.mxu0 %v1738_v51  ;;  %1554 = vmatmul.mubr.msk.f32.gmra.mrb[10].mxu1 %vm146_vm2, %v80_v62  ;;  %v85_v51 = vld [vmem:[%s2819_s0 + $0x1b8] sm:$0xff]  ;;  %v99_v62 = vld [vmem:[%s2819_s0 + $0x228] sm:$0xff] }
  0x2d   :  { %1740 = vmatprep.subr.bf16.mxu0 %v1904_v0  ;;  %1556 = vmatprep.mubr.msk.f32.mxu1 %vm1905_vm0, %v1906_v6 }
  0x30   :  { %1742 = vmatpush1.bf16.msra.mxu0 %v1741_v55  ;;  %1557 = vmatmul.mubr.msk.f32.gmra.mrb[12].mxu1 %vm146_vm2, %v83_v3  ;;  %v91_v55 = vld [vmem:[%s2819_s0 + $0x1e8] sm:$0xff] }
  0x31   :  { %1743 = vmatprep.subr.bf16.mxu0 %v1904_v0  ;;  %1559 = vmatprep.mubr.msk.f32.mxu1 %vm1905_vm0, %v1906_v6  ;;  %v35_v3 = vld [vmem:[%s2819_s0 + $0x28] sm:$0xff] }
  0x34   :  { %1745 = vmatpush1.bf16.msra.mxu0 %v1744_v59  ;;  %1560 = vmatmul.mubr.msk.f32.gmra.mrb[14].mxu1 %vm146_vm2, %v86_v8  ;;  %v97_v59 = vld [vmem:[%s2819_s0 + $0x218] sm:$0xff]  ;;  %v47_v8 = vld [vmem:[%s2819_s0 + $0x88] sm:$0xff] }
  0x35   :  { %1746 = vmatprep.subr.bf16.mxu0 %v1904_v0  ;;  %1562 = vmatprep.mubr.msk.f32.mxu1 %vm1905_vm0, %v1906_v6 }
  0x38   :  { %1748 = vmatpush1.bf16.msra.mxu0 %v1747_v63  ;;  %1563 = vmatmul.mubr.msk.f32.gmra.mrb[16].mxu1 %vm146_vm2, %v89_v10  ;;  %v103_v63 = vld [vmem:[%s2819_s0 + $0x248] sm:$0xff]  ;;  %v53_v10 = vld [vmem:[%s2819_s0 + $0xb8] sm:$0xff] }
  0x39   :  { %1749 = vmatprep.subr.bf16.mxu0 %v1904_v0  ;;  %1565 = vmatprep.mubr.msk.f32.mxu1 %vm1905_vm0, %v1906_v6 }
  0x3c   :  { %1751 = vmatpush1.bf16.msra.mxu0 %v1750_v4  ;;  %1566 = vmatmul.mubr.msk.f32.gmra.mrb[18].mxu1 %vm146_vm2, %v92_v13  ;;  %v38_v4 = vld [vmem:[%s2819_s0 + $0x40] sm:$0xff]  ;;  %v632_v13 = vld [vmem:[%s2820_s3 + $0x8] sm:$0xff] }
  0x3d   :  { %1752 = vmatprep.subr.bf16.mxu0 %v1904_v0  ;;  %1568 = vmatprep.mubr.msk.f32.mxu1 %vm1905_vm0, %v1906_v6 }
  0x40   :  { %1754 = vmatpush1.bf16.msra.mxu0 %v1753_v9  ;;  %1569 = vmatmul.mubr.msk.f32.gmra.mrb[20].mxu1 %vm146_vm2, %v95_v16  ;;  %v50_v9 = vld [vmem:[%s2819_s0 + $0xa0] sm:$0xff] }
  0x41   :  { %1755 = vmatprep.subr.bf16.mxu0 %v1904_v0  ;;  %1571 = vmatprep.mubr.msk.f32.mxu1 %vm1905_vm0, %v1906_v6  ;;  %v62_v16 = vld [vmem:[%s2819_s0 + $0x100] sm:$0xff] }
  0x43   :  { %291 = vmatmul.mubr.f32.vlgmr.msra.gmra.mrb[0].mxu0 %v30_v11  ;;  %v56_v11 = vld [vmem:[%s2819_s0 + $0xd0] sm:$0xff] }
  0x44   :  { %1757 = vmatpush3.bf16.msra.mxu0 %v2014_v19  ;;  %295 = vmatprep.mubr.f32.mxu0 %v34_v12  ;;  %v98_v19 = vld [vmem:[%s2819_s0 + $0x220] sm:$0xff] }
  0x45   :  { %1758 = vmatprep.subr.bf16.mxu0 %v1904_v0  ;;  %1572 = vmatmul.mubr.msk.f32.gmra.mrb[22].mxu1 %vm146_vm2, %v98_v19  ;;  %v631_v12 = vld [vmem:[%s2820_s3] sm:$0xff] }
  0x46   :  { %1574 = vmatprep.mubr.msk.f32.mxu1 %vm1905_vm0, %v1906_v6 }
  0x47   :  { %296 = vmatmul.mubr.f32.gmra.mrb[2].mxu0 %v33_v14  ;;  %v59_v14 = vld [vmem:[%s2819_s0 + $0xe8] sm:$0xff] }
  0x48   :  { %300 = vmatprep.mubr.f32.mxu0 %v37_v15  ;;  %1760 = vmatpush3.bf16.msra.mxu0 %v2031_v25  ;;  %v104_v25 = vld [vmem:[%s2819_s0 + $0x250] sm:$0xff]  ;;  %v1768_v15 = vpack.c.bf16 %v632_v13, %v631_v12 }
  0x49   :  { %1761 = vmatprep.subr.bf16.mxu0 %v1904_v0  ;;  %1575 = vmatmul.mubr.msk.f32.gmra.mrb[24].mxu1 %vm146_vm2, %v101_v22 }
  0x4a   :  { %1577 = vmatprep.mubr.msk.f32.mxu1 %vm1905_vm0, %v1906_v6  ;;  %1769 = vmatpush3.bf16.msra.mxu1 %v1768_v15 }
  0x4b   :  { %301 = vmatmul.mubr.f32.gmra.mrb[4].mxu0 %v36_v17  ;;  %1770 = vmatprep.subr.bf16.mxu1 %v1904_v0  ;;  %v633_v17 = vld [vmem:[%s2820_s3 + $0x10] sm:$0xff] }
  0x4c   :  { %305 = vmatprep.mubr.f32.mxu0 %v40_v18  ;;  %1763 = vmatpush3.bf16.msra.mxu0 %v2048_v31  ;;  %v55_v31 = vld [vmem:[%s2819_s0 + $0xc8] sm:$0xff]  ;;  %v634_v18 = vld [vmem:[%s2820_s3 + $0x18] sm:$0xff] }
  0x4d   :  { %1764 = vmatprep.subr.bf16.mxu0 %v1904_v0  ;;  %1578 = vmatmul.mubr.msk.f32.gmra.mrb[26].mxu1 %vm146_vm2, %v104_v25  ;;  %v1771_v19 = vpack.c.bf16 %v634_v18, %v633_v17 }
  0x4e   :  { %1598 = vmatprep.mubr.msk.f32.mxu1 %vm1905_vm0, %v1906_v6 }
  0x4f   :  { %306 = vmatmul.mubr.f32.gmra.mrb[6].mxu0 %v39_v20  ;;  %1772 = vmatpush3.bf16.msra.mxu1 %v1771_v19  ;;  %v635_v20 = vld [vmem:[%s2820_s3 + $0x20] sm:$0xff] }
  0x50   :  { %310 = vmatprep.mubr.f32.mxu0 %v43_v21  ;;  %1766 = vmatpush3.bf16.msra.mxu0 %v2057_v34  ;;  %v57_v34 = vld [vmem:[%s2819_s0 + $0xd8] sm:$0xff]  ;;  %v636_v21 = vld [vmem:[%s2820_s3 + $0x28] sm:$0xff] }
  0x51   :  { %1503 = vmatprep.subr.mxu0 %v1906_v6  ;;  %1773 = vmatprep.subr.bf16.mxu1 %v1904_v0  ;;  %v1774_v22 = vpack.c.bf16 %v636_v21, %v635_v20 }
  0x53   :  { %311 = vmatmul.mubr.f32.gmra.mrb[8].mxu0 %v42_v23  ;;  %1775 = vmatpush3.bf16.msra.mxu1 %v1774_v22  ;;  %v637_v23 = vld [vmem:[%s2820_s3 + $0x30] sm:$0xff] }
  0x54   :  { %315 = vmatprep.mubr.f32.mxu0 %v46_v24  ;;  %1504 = vmatpush3.msk.msra.mxu0 %vm222_vm1, %v2072_v39  ;;  %v67_v39 = vld [vmem:[%s2819_s0 + $0x128] sm:$0xff]  ;;  %v638_v24 = vld [vmem:[%s2820_s3 + $0x38] sm:$0xff]  ;;  %s1908_s0 = smov 16   ;;  %vm1020_vm1 = vcmask 916480  }
  0x55   :  { %1776 = vmatprep.subr.bf16.mxu1 %v1904_v0  ;;  %v1777_v25 = vpack.c.bf16 %v638_v24, %v637_v23 }
  0x57   :  { %316 = vmatmul.mubr.f32.gmra.mrb[10].mxu0 %v45_v26  ;;  %1778 = vmatpush3.bf16.msra.mxu1 %v1777_v25 }
  0x58   :  { %320 = vmatprep.mubr.f32.mxu0 %v49_v27  ;;  %1596 = vmatprep.subr.mxu1 %v1906_v6 }
  0x5b   :  { %321 = vmatmul.mubr.f32.gmra.mrb[12].mxu0 %v48_v28  ;;  %v639_v28 = vld [vmem:[%s2820_s3 + $0x40] sm:$0xff]  ;;  %s1911_s3 = smov 40  }
  0x5c   :  { %325 = vmatprep.mubr.f32.mxu0 %v52_v29  ;;  %1597 = vmatpush3.msra.mxu1 %v639_v28 }
  0x5d   :  { %1779 = vmatprep.subr.bf16.mxu1 %v1904_v0 }
  0x5f   :  { %326 = vmatmul.mubr.f32.gmra.mrb[14].mxu0 %v51_v30 }
  0x60   :  { %330 = vmatprep.mubr.f32.mxu0 %v55_v31 }
  0x63   :  { %331 = vmatmul.mubr.f32.gmra.mrb[16].mxu0 %v54_v32 }
  0x64   :  { %335 = vmatprep.mubr.f32.mxu0 %v58_v33 }
  0x67   :  { %336 = vmatmul.mubr.f32.gmra.mrb[18].mxu0 %v57_v34 }
  0x68   :  { %340 = vmatprep.mubr.f32.mxu0 %v61_v35 }
  0x6b   :  { %341 = vmatmul.mubr.f32.gmra.mrb[20].mxu0 %v60_v36 }
  0x6c   :  { %345 = vmatprep.mubr.f32.mxu0 %v64_v37 }
  0x6f   :  { %346 = vmatmul.mubr.f32.gmra.mrb[22].mxu0 %v63_v38 }
  0x70   :  { %350 = vmatprep.mubr.f32.mxu0 %v67_v39 }
  0x73   :  { %351 = vmatmul.mubr.f32.gmra.mrb[24].mxu0 %v66_v40 }
  0x74   :  { %355 = vmatprep.mubr.f32.mxu0 %v70_v41 }
  0x77   :  { %356 = vmatmul.mubr.f32.gmra.mrb[26].mxu0 %v69_v42 }
  0x78   :  { %360 = vmatprep.mubr.f32.mxu0 %v73_v43 }
  0x7b   :  { %361 = vmatmul.mubr.f32.gmra.mrb[28].mxu0 %v72_v44 }
  0x7c   :  { %365 = vmatprep.mubr.f32.mxu0 %v76_v45 }
  0x7f   :  { %366 = vmatmul.mubr.f32.gmra.mrb[30].mxu0 %v75_v46 }
  0x80   :  { %370 = vmatprep.mubr.f32.mxu0 %v79_v47 }
  0x83   :  { %371 = vmatmul.mubr.f32.gmra.mrb[32].mxu0 %v78_v48 }
  0x84   :  { %375 = vmatprep.mubr.f32.mxu0 %v82_v49 }
  0x87   :  { %376 = vmatmul.mubr.f32.gmra.mrb[34].mxu0 %v81_v50 }
  0x88   :  { %380 = vmatprep.mubr.f32.mxu0 %v85_v51 }
  0x8b   :  { %381 = vmatmul.mubr.f32.gmra.mrb[36].mxu0 %v84_v52 }
  0x8c   :  { %385 = vmatprep.mubr.f32.mxu0 %v88_v53 }
  0x8f   :  { %386 = vmatmul.mubr.f32.gmra.mrb[38].mxu0 %v87_v54 }
  0x90   :  { %390 = vmatprep.mubr.f32.mxu0 %v91_v55 }
  0x93   :  { %391 = vmatmul.mubr.f32.gmra.mrb[40].mxu0 %v90_v56 }
  0x94   :  { %395 = vmatprep.mubr.f32.mxu0 %v94_v57 }
  0x97   :  { %396 = vmatmul.mubr.f32.gmra.mrb[42].mxu0 %v93_v58 }
  0x98   :  { %400 = vmatprep.mubr.f32.mxu0 %v97_v59 }
  0x9b   :  { %401 = vmatmul.mubr.f32.gmra.mrb[44].mxu0 %v96_v60 }
  0x9c   :  { %405 = vmatprep.mubr.f32.mxu0 %v100_v61 }
  0x9f   :  { %406 = vmatmul.mubr.f32.gmra.mrb[46].mxu0 %v99_v62 }
  0xa0   :  { %410 = vmatprep.mubr.f32.mxu0 %v103_v63 }
  0xa3   :  { %411 = vmatmul.mubr.f32.gmra.mrb[48].mxu0 %v102_v1 }
  0xa4   :  { %1505 = vmatprep.mubr.msk.f32.mxu0 %vm1905_vm0, %v1906_v6 }
  0xa7   :  { %1506 = vmatmul.mubr.msk.f32.vlgmr.msra.gmra.mrb[0].mxu0 %vm146_vm2, %v32_v2 }
  0xa8   :  { %1508 = vmatprep.mubr.msk.f32.mxu0 %vm1905_vm0, %v1906_v6 }
  0xab   :  { %1509 = vmatmul.mubr.msk.f32.gmra.mrb[2].mxu0 %vm146_vm2, %v35_v3 }
  0xac   :  { %1511 = vmatprep.mubr.msk.f32.mxu0 %vm1905_vm0, %v1906_v6 }
  0xaf   :  { %1512 = vmatmul.mubr.msk.f32.gmra.mrb[4].mxu0 %vm146_vm2, %v38_v4 }
  0xb0   :  { %1514 = vmatprep.mubr.msk.f32.mxu0 %vm1905_vm0, %v1906_v6 }
  0xb3   :  { %1515 = vmatmul.mubr.msk.f32.gmra.mrb[6].mxu0 %vm146_vm2, %v41_v5 }
  0xb4   :  { %1517 = vmatprep.mubr.msk.f32.mxu0 %vm1905_vm0, %v1906_v6 }
  0xb7   :  { %1518 = vmatmul.mubr.msk.f32.gmra.mrb[8].mxu0 %vm146_vm2, %v44_v7 }
  0xb8   :  { %1520 = vmatprep.mubr.msk.f32.mxu0 %vm1905_vm0, %v1906_v6 }
  0xbb   :  { %1521 = vmatmul.mubr.msk.f32.gmra.mrb[10].mxu0 %vm146_vm2, %v47_v8 }
  0xbc   :  { %1523 = vmatprep.mubr.msk.f32.mxu0 %vm1905_vm0, %v1906_v6 }
  0xbf   :  { %1524 = vmatmul.mubr.msk.f32.gmra.mrb[12].mxu0 %vm146_vm2, %v50_v9 }
  0xc0   :  { %1526 = vmatprep.mubr.msk.f32.mxu0 %vm1905_vm0, %v1906_v6 }
  0xc3   :  { %1527 = vmatmul.mubr.msk.f32.gmra.mrb[14].mxu0 %vm146_vm2, %v53_v10 }
  0xc4   :  { %1529 = vmatprep.mubr.msk.f32.mxu0 %vm1905_vm0, %v1906_v6 }
  0xc7   :  { %1530 = vmatmul.mubr.msk.f32.gmra.mrb[16].mxu0 %vm146_vm2, %v56_v11 }
  0xc8   :  { %1532 = vmatprep.mubr.msk.f32.mxu0 %vm1905_vm0, %v1906_v6 }
  0xcb   :  { %1533 = vmatmul.mubr.msk.f32.gmra.mrb[18].mxu0 %vm146_vm2, %v59_v14 }
  0xcc   :  { %1535 = vmatprep.mubr.msk.f32.mxu0 %vm1905_vm0, %v1906_v6 }
  0xcf   :  { %1536 = vmatmul.mubr.msk.f32.gmra.mrb[20].mxu0 %vm146_vm2, %v62_v16  ;;  %vm1022_vm2 = vcmask 982016  }
  0xeb   :  { %v537_v26 = vpop.f32.mrb[0].mxu1 }
  0xec   :  { %v1540_v27 = vpop.f32.mrb[1].mxu1 }
  0xef   :  { %v542_v29 = vpop.f32.mrb[2].mxu1 }
  0xf0   :  { %v1543_v30 = vpop.f32.mrb[3].mxu1 }
  0xf3   :  { %v547_v31 = vpop.f32.mrb[4].mxu1 }
  0xf4   :  { %v1546_v32 = vpop.f32.mrb[5].mxu1 }
  0xf7   :  { %v552_v33 = vpop.f32.mrb[6].mxu1 }
  0xf8   :  { %v1549_v34 = vpop.f32.mrb[7].mxu1 }
  0xfb   :  { %v557_v35 = vpop.f32.mrb[8].mxu1 }
  0xfc   :  { %v1552_v36 = vpop.f32.mrb[9].mxu1 }
  0xff   :  { %v562_v37 = vpop.f32.mrb[10].mxu1 }
 0x100   :  { %v1555_v38 = vpop.f32.mrb[11].mxu1 }
 0x103   :  { %v567_v39 = vpop.f32.mrb[12].mxu1 }
 0x104   :  { %v1558_v40 = vpop.f32.mrb[13].mxu1 }
 0x107   :  { %v572_v41 = vpop.f32.mrb[14].mxu1 }
 0x108   :  { %v1561_v42 = vpop.f32.mrb[15].mxu1 }
 0x10b   :  { %v577_v43 = vpop.f32.mrb[16].mxu1 }
 0x10c   :  { %v1564_v44 = vpop.f32.mrb[17].mxu1 }
 0x10f   :  { %v582_v45 = vpop.f32.mrb[18].mxu1 }
 0x110   :  { %v1567_v46 = vpop.f32.mrb[19].mxu1 }
 0x113   :  { %v587_v47 = vpop.f32.mrb[20].mxu1 }
 0x114   :  { %v1570_v48 = vpop.f32.mrb[21].mxu1 }
 0x118   :  { %v592_v49 = vpop.f32.mrb[22].mxu1 }
 0x119   :  { %v1573_v50 = vpop.f32.mrb[23].mxu1 }
 0x11c   :  { %v597_v51 = vpop.f32.mrb[24].mxu1 }
 0x11d   :  { %v1576_v52 = vpop.f32.mrb[25].mxu1 }
 0x120   :  { %v602_v53 = vpop.f32.mrb[26].mxu1 }
 0x121   :  { %v1579_v54 = vpop.f32.mrb[27].mxu1 }
 0x142   :  { %v347_v55 = vpop.f32.mrb[22].mxu0 }
 0x143   :  { %v349_v56 = vpop.f32.mrb[23].mxu0  ;;  %v2474_v57 = vadd.f32 %v537_v26, %v347_v55 }
 0x146   :  { %v352_v58 = vpop.f32.mrb[24].mxu0 }
 0x147   :  { %v354_v59 = vpop.f32.mrb[25].mxu0  ;;  %v2476_v60 = vadd.f32 %v542_v29, %v352_v58 }
 0x14a   :  { %v357_v61 = vpop.f32.mrb[26].mxu0 }
 0x14b   :  { %v359_v62 = vpop.f32.mrb[27].mxu0  ;;  %v2478_v63 = vadd.f32 %v547_v31, %v357_v61 }
 0x14e   :  { %v362_v1 = vpop.f32.mrb[28].mxu0 }
 0x14f   :  { %v364_v2 = vpop.f32.mrb[29].mxu0  ;;  %v2480_v3 = vadd.f32 %v552_v33, %v362_v1 }
 0x152   :  { %v367_v4 = vpop.f32.mrb[30].mxu0 }
 0x153   :  { %v369_v5 = vpop.f32.mrb[31].mxu0  ;;  %v2482_v7 = vadd.f32 %v557_v35, %v367_v4 }
 0x156   :  { %v372_v8 = vpop.f32.mrb[32].mxu0 }
 0x157   :  { %v374_v9 = vpop.f32.mrb[33].mxu0  ;;  %v2484_v10 = vadd.f32 %v562_v37, %v372_v8 }
 0x15a   :  { %v377_v11 = vpop.f32.mrb[34].mxu0 }
 0x15b   :  { %v379_v12 = vpop.f32.mrb[35].mxu0  ;;  %v2486_v13 = vadd.f32 %v567_v39, %v377_v11 }
 0x15c   :  { %v617_v12 = vmax.f32 %v2474_v57, 0.0  ;;  %v620_v57 = vmax.f32 %v2480_v3, 0.0 }
 0x15d   :  { %v623_v3 = vmax.f32 %v2486_v13, 0.0 }
 0x15e   :  { %v382_v14 = vpop.f32.mrb[36].mxu0 }
 0x15f   :  { %v384_v15 = vpop.f32.mrb[37].mxu0  ;;  %v2488_v16 = vadd.f32 %v572_v41, %v382_v14  ;;  %v618_v14 = vmax.f32 %v2476_v60, 0.0  ;;  %v621_v60 = vmax.f32 %v2482_v7, 0.0 }
 0x160   :  { %v619_v15 = vmax.f32 %v2478_v63, 0.0  ;;  %v622_v63 = vmax.f32 %v2484_v10, 0.0 }
 0x161   :  { %v624_v7 = vmax.f32 %v2488_v16, 0.0 }
 0x162   :  { %v387_v17 = vpop.f32.mrb[38].mxu0 }
 0x163   :  { %v389_v18 = vpop.f32.mrb[39].mxu0  ;;  %v2490_v19 = vadd.f32 %v577_v43, %v387_v17 }
 0x165   :  { %v625_v10 = vmax.f32 %v2490_v19, 0.0 }
 0x166   :  { %v392_v20 = vpop.f32.mrb[40].mxu0 }
 0x167   :  { %v394_v21 = vpop.f32.mrb[41].mxu0  ;;  %v2492_v22 = vadd.f32 %v582_v45, %v392_v20  ;;  %v1064_v20 = vld [vmem:[%s2821_s4] sm:$0xff] }
 0x168   :  { %v1065_v21 = vld [vmem:[%s2821_s4 + $0x8] sm:$0xff] }
 0x169   :  { %v626_v13 = vmax.f32 %v2492_v22, 0.0  ;;  %v1780_v22 = vpack.c.bf16 %v1065_v21, %v1064_v20 }
 0x16a   :  { %v397_v23 = vpop.f32.mrb[42].mxu0 }
 0x16b   :  { %v399_v24 = vpop.f32.mrb[43].mxu0  ;;  %v2494_v25 = vadd.f32 %v587_v47, %v397_v23  ;;  %v640_v23 = vlaneseq }
 0x16d   :  { %v627_v16 = vmax.f32 %v2494_v25, 0.0  ;;  %v2596_v24 = vshrl.u32 %v640_v23, 7  ;;  %v1066_v25 = vld [vmem:[%s2821_s4 + $0x10] sm:$0xff] }
 0x16e   :  { %v402_v26 = vpop.f32.mrb[44].mxu0 }
 0x16f   :  { %v404_v27 = vpop.f32.mrb[45].mxu0  ;;  %v2496_v28 = vadd.f32 %v592_v49, %v402_v26  ;;  %v1067_v26 = vld [vmem:[%s2821_s4 + $0x18] sm:$0xff] }
 0x170   :  { %v1783_v27 = vpack.c.bf16 %v1067_v26, %v1066_v25 }
 0x171   :  { %v628_v17 = vmax.f32 %v2496_v28, 0.0  ;;  %v642_v28 = vsub.s32 0, %v2596_v24 }
 0x172   :  { %v407_v29 = vpop.f32.mrb[46].mxu0 }
 0x173   :  { %v409_v30 = vpop.f32.mrb[47].mxu0  ;;  %v2498_v31 = vadd.f32 %v597_v51, %v407_v29  ;;  %v2608_v29 = vld [vmem:[%s2822_s7] sm:$0x7]  ;;  %s1907_s7 = smov 8  }
 0x175   :  { %v629_v18 = vmax.f32 %v2498_v31, 0.0 }
 0x176   :  { %v412_v32 = vpop.f32.mrb[48].mxu0 }
 0x177   :  { %v414_v33 = vpop.f32.mrb[49].mxu0  ;;  %v2500_v34 = vadd.f32 %v602_v53, %v412_v32  ;;  %v2614_v32 = vrot.slane %v2608_v29, %v642_v28  ;;  %v1078_v28 = vld [vmem:[%s2821_s4 + $0x70] sm:$0xff] }
 0x179   :  { %v630_v19 = vmax.f32 %v2500_v34, 0.0  ;;  %v1068_v34 = vld [vmem:[%s2821_s4 + $0x20] sm:$0xff] }
 0x17a   :  { %v482_v35 = vpop.f32.mrb[0].mxu0 }
 0x17b   :  { %v606_v36 = vmax.f32 %v482_v35, 0.0  ;;  %v1507_v37 = vpop.f32.mrb[1].mxu0  ;;  %v1069_v35 = vld [vmem:[%s2821_s4 + $0x28] sm:$0xff] }
 0x17d   :  { %1599 = vmatmul.mubr.msk.f32.vlgmr.msra.gmra.mrb[28].mxu1 %vm644_vm3, %v606_v36 }
 0x17e   :  { %v487_v38 = vpop.f32.mrb[2].mxu0  ;;  %1601 = vmatprep.mubr.msk.f32.mxu1 %vm1905_vm0, %v1906_v6  ;;  %1781 = vmatpush1.bf16.msra.mxu1 %v1780_v22 }
 0x17f   :  { %v607_v39 = vmax.f32 %v487_v38, 0.0  ;;  %v1510_v40 = vpop.f32.mrb[3].mxu0  ;;  %1782 = vmatprep.subr.bf16.mxu1 %v1904_v0  ;;  %v1786_v38 = vpack.c.bf16 %v1069_v35, %v1068_v34 }
 0x181   :  { %1602 = vmatmul.mubr.msk.f32.gmra.mrb[30].mxu1 %vm644_vm3, %v607_v39 }
 0x182   :  { %v492_v41 = vpop.f32.mrb[4].mxu0  ;;  %1604 = vmatprep.mubr.msk.f32.mxu1 %vm1905_vm0, %v1906_v6  ;;  %1784 = vmatpush1.bf16.msra.mxu1 %v1783_v27 }
 0x183   :  { %v608_v42 = vmax.f32 %v492_v41, 0.0  ;;  %v1513_v43 = vpop.f32.mrb[5].mxu0  ;;  %1785 = vmatprep.subr.bf16.mxu1 %v1904_v0 }
 0x185   :  { %1605 = vmatmul.mubr.msk.f32.gmra.mrb[32].mxu1 %vm644_vm3, %v608_v42 }
 0x186   :  { %v497_v44 = vpop.f32.mrb[6].mxu0  ;;  %1607 = vmatprep.mubr.msk.f32.mxu1 %vm1905_vm0, %v1906_v6  ;;  %1787 = vmatpush1.bf16.msra.mxu1 %v1786_v38 }
 0x187   :  { %v609_v45 = vmax.f32 %v497_v44, 0.0  ;;  %v1516_v46 = vpop.f32.mrb[7].mxu0  ;;  %1788 = vmatprep.subr.bf16.mxu1 %v1904_v0 }
 0x188   :  { %v1071_v46 = vld [vmem:[%s2821_s4 + $0x38] sm:$0xff] }
 0x189   :  { %1608 = vmatmul.mubr.msk.f32.gmra.mrb[34].mxu1 %vm644_vm3, %v609_v45  ;;  %v1070_v45 = vld [vmem:[%s2821_s4 + $0x30] sm:$0xff] }
 0x18a   :  { %v502_v47 = vpop.f32.mrb[8].mxu0  ;;  %1610 = vmatprep.mubr.msk.f32.mxu1 %vm1905_vm0, %v1906_v6 }
 0x18b   :  { %v610_v48 = vmax.f32 %v502_v47, 0.0  ;;  %v1519_v49 = vpop.f32.mrb[9].mxu0 }
 0x18c   :  { %v1789_v49 = vpack.c.bf16 %v1071_v46, %v1070_v45 }
 0x18d   :  { %1611 = vmatmul.mubr.msk.f32.gmra.mrb[36].mxu1 %vm644_vm3, %v610_v48 }
 0x18e   :  { %v507_v50 = vpop.f32.mrb[10].mxu0  ;;  %1613 = vmatprep.mubr.msk.f32.mxu1 %vm1905_vm0, %v1906_v6  ;;  %1790 = vmatpush1.bf16.msra.mxu1 %v1789_v49 }
 0x18f   :  { %v611_v51 = vmax.f32 %v507_v50, 0.0  ;;  %v1522_v52 = vpop.f32.mrb[11].mxu0  ;;  %1791 = vmatprep.subr.bf16.mxu1 %v1904_v0 }
 0x191   :  { %1614 = vmatmul.mubr.msk.f32.gmra.mrb[38].mxu1 %vm644_vm3, %v611_v51 }
 0x192   :  { %v512_v53 = vpop.f32.mrb[12].mxu0  ;;  %1616 = vmatprep.mubr.msk.f32.mxu1 %vm1905_vm0, %v1906_v6 }
 0x193   :  { %v612_v54 = vmax.f32 %v512_v53, 0.0  ;;  %v1525_v55 = vpop.f32.mrb[13].mxu0 }
 0x195   :  { %1617 = vmatmul.mubr.msk.f32.gmra.mrb[40].mxu1 %vm644_vm3, %v612_v54 }
 0x196   :  { %v517_v56 = vpop.f32.mrb[14].mxu0  ;;  %1619 = vmatprep.mubr.msk.f32.mxu1 %vm1905_vm0, %v1906_v6 }
 0x197   :  { %v613_v58 = vmax.f32 %v517_v56, 0.0  ;;  %v1528_v59 = vpop.f32.mrb[15].mxu0  ;;  %v1072_v56 = vld [vmem:[%s2821_s4 + $0x40] sm:$0xff] }
 0x199   :  { %1620 = vmatmul.mubr.msk.f32.gmra.mrb[42].mxu1 %vm644_vm3, %v613_v58  ;;  %v1073_v58 = vld [vmem:[%s2821_s4 + $0x48] sm:$0xff] }
 0x19a   :  { %v522_v61 = vpop.f32.mrb[16].mxu0  ;;  %1622 = vmatprep.mubr.msk.f32.mxu1 %vm1905_vm0, %v1906_v6 }
 0x19b   :  { %v614_v62 = vmax.f32 %v522_v61, 0.0  ;;  %v1531_v1 = vpop.f32.mrb[17].mxu0 }
 0x19d   :  { %1623 = vmatmul.mubr.msk.f32.gmra.mrb[44].mxu1 %vm644_vm3, %v614_v62  ;;  %v1792_v62 = vpack.c.bf16 %v1073_v58, %v1072_v56 }
 0x19e   :  { %v527_v2 = vpop.f32.mrb[18].mxu0  ;;  %1625 = vmatprep.mubr.msk.f32.mxu1 %vm1905_vm0, %v1906_v6 }
 0x19f   :  { %v615_v4 = vmax.f32 %v527_v2, 0.0  ;;  %v1534_v5 = vpop.f32.mrb[19].mxu0  ;;  %1793 = vmatpush1.bf16.msra.mxu1 %v1792_v62 }
 0x1a0   :  { %1794 = vmatprep.subr.bf16.mxu1 %v1904_v0 }
 0x1a1   :  { %1626 = vmatmul.mubr.msk.f32.gmra.mrb[46].mxu1 %vm644_vm3, %v615_v4 }
 0x1a2   :  { %v532_v8 = vpop.f32.mrb[20].mxu0  ;;  %1628 = vmatprep.mubr.msk.f32.mxu1 %vm1905_vm0, %v1906_v6 }
 0x1a3   :  { %v616_v9 = vmax.f32 %v532_v8, 0.0  ;;  %v1537_v11 = vpop.f32.mrb[21].mxu0 }
 0x1a4   :  { %v1074_v11 = vld [vmem:[%s2821_s4 + $0x50] sm:$0xff] }
 0x1a5   :  { %1629 = vmatmul.mubr.msk.f32.gmra.mrb[48].mxu1 %vm644_vm3, %v616_v9 }
 0x1a6   :  { %1631 = vmatprep.mubr.msk.f32.mxu1 %vm1905_vm0, %v1906_v6 }
 0x1a9   :  { %1632 = vmatmul.mubr.msk.f32.gmra.mrb[50].mxu1 %vm644_vm3, %v617_v12  ;;  %v1075_v12 = vld [vmem:[%s2821_s4 + $0x58] sm:$0xff] }
 0x1aa   :  { %1634 = vmatprep.mubr.msk.f32.mxu1 %vm1905_vm0, %v1906_v6 }
 0x1ad   :  { %1635 = vmatmul.mubr.msk.f32.gmra.mrb[52].mxu1 %vm644_vm3, %v618_v14 }
 0x1ae   :  { %1637 = vmatprep.mubr.msk.f32.mxu1 %vm1905_vm0, %v1906_v6 }
 0x1b1   :  { %1638 = vmatmul.mubr.msk.f32.gmra.mrb[54].mxu1 %vm644_vm3, %v619_v15 }
 0x1b2   :  { %1640 = vmatprep.mubr.msk.f32.mxu1 %vm1905_vm0, %v1906_v6 }
 0x1b5   :  { %1641 = vmatmul.mubr.msk.f32.gmra.mrb[56].mxu1 %vm644_vm3, %v620_v57  ;;  %v1795_v57 = vpack.c.bf16 %v1075_v12, %v1074_v11 }
 0x1b6   :  { %1643 = vmatprep.mubr.msk.f32.mxu1 %vm1905_vm0, %v1906_v6 }
 0x1b7   :  { %1796 = vmatpush1.bf16.msra.mxu1 %v1795_v57 }
 0x1b8   :  { %1797 = vmatprep.subr.bf16.mxu1 %v1904_v0 }
 0x1b9   :  { %1644 = vmatmul.mubr.msk.f32.gmra.mrb[58].mxu1 %vm644_vm3, %v621_v60 }
 0x1ba   :  { %1646 = vmatprep.mubr.msk.f32.mxu1 %vm1905_vm0, %v1906_v6 }
 0x1bd   :  { %1647 = vmatmul.mubr.msk.f32.gmra.mrb[60].mxu1 %vm644_vm3, %v622_v63 }
 0x1be   :  { %1649 = vmatprep.mubr.msk.f32.mxu1 %vm1905_vm0, %v1906_v6 }
 0x1c1   :  { %1650 = vmatmul.mubr.msk.f32.gmra.mrb[62].mxu1 %vm644_vm3, %v623_v3 }
 0x1c2   :  { %1652 = vmatprep.mubr.msk.f32.mxu1 %vm1905_vm0, %v1906_v6 }
 0x1c5   :  { %1653 = vmatmul.mubr.msk.f32.gmra.mrb[64].mxu1 %vm644_vm3, %v624_v7 }
 0x1c6   :  { %1655 = vmatprep.mubr.msk.f32.mxu1 %vm1905_vm0, %v1906_v6 }
 0x1c9   :  { %1656 = vmatmul.mubr.msk.f32.gmra.mrb[66].mxu1 %vm644_vm3, %v625_v10 }
 0x1ca   :  { %1658 = vmatprep.mubr.msk.f32.mxu1 %vm1905_vm0, %v1906_v6 }
 0x1cd   :  { %1659 = vmatmul.mubr.msk.f32.gmra.mrb[68].mxu1 %vm644_vm3, %v626_v13 }
 0x1ce   :  { %1661 = vmatprep.mubr.msk.f32.mxu1 %vm1905_vm0, %v1906_v6 }
 0x1d1   :  { %1662 = vmatmul.mubr.msk.f32.gmra.mrb[70].mxu1 %vm644_vm3, %v627_v16  ;;  %v1076_v16 = vld [vmem:[%s2821_s4 + $0x60] sm:$0xff] }
 0x1d2   :  { %1664 = vmatprep.mubr.msk.f32.mxu1 %vm1905_vm0, %v1906_v6 }
 0x1d5   :  { %1665 = vmatmul.mubr.msk.f32.gmra.mrb[72].mxu1 %vm644_vm3, %v628_v17  ;;  %v1077_v17 = vld [vmem:[%s2821_s4 + $0x68] sm:$0xff] }
 0x1d6   :  { %1667 = vmatprep.mubr.msk.f32.mxu1 %vm1905_vm0, %v1906_v6  ;;  %v1798_v20 = vpack.c.bf16 %v1077_v17, %v1076_v16 }
 0x1d8   :  { %1799 = vmatpush1.bf16.msra.mxu1 %v1798_v20 }
 0x1d9   :  { %1668 = vmatmul.mubr.msk.f32.gmra.mrb[74].mxu1 %vm644_vm3, %v629_v18  ;;  %1800 = vmatprep.subr.bf16.mxu1 %v1904_v0 }
 0x1da   :  { %1670 = vmatprep.mubr.msk.f32.mxu1 %vm1905_vm0, %v1906_v6 }
 0x1dd   :  { %1671 = vmatmul.mubr.msk.f32.gmra.mrb[76].mxu1 %vm644_vm3, %v630_v19 }
 0x250   :  { %v2610_v30 = vpop.f32.mrb[28].mxu1 }
 0x251   :  { %v1600_v31 = vpop.f32.mrb[29].mxu1 }
 0x252   :  { %v1079_v31 = vld [vmem:[%s2821_s4 + $0x78] sm:$0xff] }
 0x253   :  { %v1801_v35 = vpack.c.bf16 %v1079_v31, %v1078_v28 }
 0x254   :  { %v791_v33 = vpop.f32.mrb[30].mxu1 }
 0x255   :  { %v792_v36 = vadd.f32 %v791_v33, %v2614_v32  ;;  %v1603_v37 = vpop.f32.mrb[31].mxu1  ;;  %1802 = vmatpush1.bf16.msra.mxu1 %v1801_v35 }
 0x256   :  { %1803 = vmatprep.subr.bf16.mxu1 %v1904_v0 }
 0x257   :  { %v911_v39 = vmax.f32 %v792_v36, 0.0 }
 0x258   :  { %v796_v40 = vpop.f32.mrb[32].mxu1 }
 0x259   :  { %v797_v41 = vadd.f32 %v796_v40, %v2614_v32  ;;  %936 = vrot.lane.b32.xlu0 %v911_v39, %s1907_s7  ;;  %v1606_v42 = vpop.f32.mrb[33].mxu1 }
 0x25a   :  { %v1080_v42 = vld [vmem:[%s2821_s4 + $0x80] sm:$0xff] }
 0x25b   :  { %v912_v43 = vmax.f32 %v797_v41, 0.0 }
 0x25c   :  { %v801_v44 = vpop.f32.mrb[34].mxu1 }
 0x25d   :  { %v802_v47 = vadd.f32 %v801_v44, %v2614_v32  ;;  %940 = vrot.lane.b32.xlu0 %v912_v43, %s1908_s0  ;;  %v1609_v48 = vpop.f32.mrb[35].mxu1  ;;  %v1081_v43 = vld [vmem:[%s2821_s4 + $0x88] sm:$0xff] }
 0x25e   :  { %v1804_v46 = vpack.c.bf16 %v1081_v43, %v1080_v42  ;;  %v1167_v42 = vld [vmem:[%s2823_s1] sm:$0xff] }
 0x25f   :  { %v913_v50 = vmax.f32 %v802_v47, 0.0 }
 0x260   :  { %v806_v51 = vpop.f32.mrb[36].mxu1  ;;  %1805 = vmatpush1.bf16.msra.mxu1 %v1804_v46 }
 0x261   :  { %v807_v52 = vadd.f32 %v806_v51, %v2614_v32  ;;  %944 = vrot.lane.b32.xlu1 %v913_v50, %s1909_s21  ;;  %v1612_v53 = vpop.f32.mrb[37].mxu1  ;;  %1806 = vmatprep.subr.bf16.mxu1 %v1904_v0 }
 0x262   :  { %v1082_v53 = vld [vmem:[%s2821_s4 + $0x90] sm:$0xff] }
 0x263   :  { %v914_v54 = vmax.f32 %v807_v52, 0.0 }
 0x264   :  { %v811_v55 = vpop.f32.mrb[38].mxu1 }
 0x265   :  { %v812_v59 = vadd.f32 %v811_v55, %v2614_v32  ;;  %948 = vrot.lane.b32.xlu1 %v914_v54, %s1910_s26  ;;  %v1615_v61 = vpop.f32.mrb[39].mxu1  ;;  %v1083_v54 = vld [vmem:[%s2821_s4 + $0x98] sm:$0xff] }
 0x266   :  { %v1807_v58 = vpack.c.bf16 %v1083_v54, %v1082_v53 }
 0x267   :  { %v915_v1 = vmax.f32 %v812_v59, 0.0 }
 0x268   :  { %v816_v2 = vpop.f32.mrb[40].mxu1  ;;  %1808 = vmatpush1.bf16.msra.mxu1 %v1807_v58 }
 0x269   :  { %v817_v4 = vadd.f32 %v816_v2, %v2614_v32  ;;  %952 = vrot.lane.b32.xlu0 %v915_v1, %s1911_s3  ;;  %v1618_v5 = vpop.f32.mrb[41].mxu1  ;;  %1809 = vmatprep.subr.bf16.mxu1 %v1904_v0  ;;  %v1084_v2 = vld [vmem:[%s2821_s4 + $0xa0] sm:$0xff] }
 0x26b   :  { %v916_v8 = vmax.f32 %v817_v4, 0.0  ;;  %v1085_v4 = vld [vmem:[%s2821_s4 + $0xa8] sm:$0xff] }
 0x26c   :  { %v821_v9 = vpop.f32.mrb[42].mxu1 }
 0x26d   :  { %v822_v14 = vadd.f32 %v821_v9, %v2614_v32  ;;  %956 = vrot.lane.b32.xlu1 %v916_v8, %s1912_s9  ;;  %v1621_v15 = vpop.f32.mrb[43].mxu1  ;;  %v1810_v9 = vpack.c.bf16 %v1085_v4, %v1084_v2 }
 0x26f   :  { %v917_v60 = vmax.f32 %v822_v14, 0.0  ;;  %1811 = vmatpush1.bf16.msra.mxu1 %v1810_v9 }
 0x270   :  { %v826_v63 = vpop.f32.mrb[44].mxu1  ;;  %1812 = vmatprep.subr.bf16.mxu1 %v1904_v0 }
 0x271   :  { %v827_v3 = vadd.f32 %v826_v63, %v2614_v32  ;;  %960 = vrot.lane.b32.xlu0 %v917_v60, %s1913_s10  ;;  %v1624_v7 = vpop.f32.mrb[45].mxu1  ;;  %v1086_v63 = vld [vmem:[%s2821_s4 + $0xb0] sm:$0xff] }
 0x273   :  { %v918_v10 = vmax.f32 %v827_v3, 0.0  ;;  %v1087_v3 = vld [vmem:[%s2821_s4 + $0xb8] sm:$0xff] }
 0x274   :  { %v831_v13 = vpop.f32.mrb[46].mxu1 }
 0x275   :  { %v832_v18 = vadd.f32 %v831_v13, %v2614_v32  ;;  %964 = vrot.lane.b32.xlu0 %v918_v10, %s1914_s15  ;;  %v1627_v19 = vpop.f32.mrb[47].mxu1  ;;  %v1813_v13 = vpack.c.bf16 %v1087_v3, %v1086_v63 }
 0x277   :  { %v919_v21 = vmax.f32 %v832_v18, 0.0  ;;  %1814 = vmatpush1.bf16.msra.mxu1 %v1813_v13 }
 0x278   :  { %v836_v22 = vpop.f32.mrb[48].mxu1  ;;  %1144 = vmatprep.subr.mxu1 %v1906_v6 }
 0x279   :  { %v837_v23 = vadd.f32 %v836_v22, %v2614_v32  ;;  %968 = vrot.lane.b32.xlu0 %v919_v21, %s1915_s16  ;;  %v1630_v25 = vpop.f32.mrb[49].mxu1  ;;  %s1921_s16 = smov 120   ;;  %v1088_v22 = vld [vmem:[%s2821_s4 + $0xc0] sm:$0xff] }
 0x27b   :  { %v920_v26 = vmax.f32 %v837_v23, 0.0  ;;  %1145 = vmatpush1.msra.mxu1 %v1088_v22 }
 0x27c   :  { %v841_v27 = vpop.f32.mrb[50].mxu1  ;;  %1815 = vmatprep.subr.bf16.mxu1 %v1904_v0 }
 0x27d   :  { %v842_v33 = vadd.f32 %v841_v27, %v2614_v32  ;;  %972 = vrot.lane.b32.xlu0 %v920_v26, %s1916_s20  ;;  %v1633_v34 = vpop.f32.mrb[51].mxu1 }
 0x27f   :  { %v921_v36 = vmax.f32 %v842_v33, 0.0 }
 0x280   :  { %v846_v37 = vpop.f32.mrb[52].mxu1 }
 0x281   :  { %v847_v38 = vadd.f32 %v846_v37, %v2614_v32  ;;  %976 = vrot.lane.b32.xlu0 %v921_v36, %s1917_s22  ;;  %v1636_v39 = vpop.f32.mrb[53].mxu1 }
 0x283   :  { %v922_v40 = vmax.f32 %v847_v38, 0.0 }
 0x284   :  { %v851_v41 = vpop.f32.mrb[54].mxu1 }
 0x285   :  { %v852_v44 = vadd.f32 %v851_v41, %v2614_v32  ;;  %980 = vrot.lane.b32.xlu0 %v922_v40, %s1918_s28  ;;  %v1639_v45 = vpop.f32.mrb[55].mxu1 }
 0x287   :  { %v923_v47 = vmax.f32 %v852_v44, 0.0 }
 0x288   :  { %v856_v48 = vpop.f32.mrb[56].mxu1 }
 0x289   :  { %v857_v49 = vadd.f32 %v856_v48, %v2614_v32  ;;  %984 = vrot.lane.b32.xlu0 %v923_v47, %s1919_s29  ;;  %v1642_v50 = vpop.f32.mrb[57].mxu1 }
 0x28b   :  { %v924_v51 = vmax.f32 %v857_v49, 0.0 }
 0x28c   :  { %v861_v52 = vpop.f32.mrb[58].mxu1 }
 0x28d   :  { %v862_v55 = vadd.f32 %v861_v52, %v2614_v32  ;;  %988 = vrot.lane.b32.xlu0 %v924_v51, %s1920_s14  ;;  %v1645_v56 = vpop.f32.mrb[59].mxu1 }
 0x28f   :  { %v925_v59 = vmax.f32 %v862_v55, 0.0 }
 0x290   :  { %v2694_v61 = vpop.f32.mrb[60].mxu1 }
 0x291   :  { %992 = vrot.lane.b32.xlu0 %v925_v59, %s1921_s16  ;;  %v1648_v62 = vpop.f32.mrb[61].mxu1  ;;  %v787_v59 = vadd.f32 %v2610_v30, %v2614_v32  ;;  %v867_v4 = vadd.f32 %v2694_v61, %v2614_v32 }
 0x294   :  { %v871_v1 = vpop.f32.mrb[62].mxu1 }
 0x295   :  { %v872_v5 = vadd.f32 %v871_v1, %v2614_v32  ;;  %v1651_v8 = vpop.f32.mrb[63].mxu1  ;;  %v910_v1 = vmax.f32 %v787_v59, 0.0 }
 0x297   :  { %v927_v11 = vmax.f32 %v872_v5, 0.0 }
 0x298   :  { %v876_v12 = vpop.f32.mrb[64].mxu1 }
 0x299   :  { %v877_v14 = vadd.f32 %v876_v12, %v2614_v32  ;;  %1025 = vrot.lane.b32.xlu1 %v927_v11, %s1907_s7  ;;  %v1654_v15 = vpop.f32.mrb[65].mxu1  ;;  %v926_v12 = vmax.f32 %v867_v4, 0.0 }
 0x29b   :  { %v928_v57 = vmax.f32 %v877_v14, 0.0 }
 0x29c   :  { %v881_v60 = vpop.f32.mrb[66].mxu1 }
 0x29d   :  { %v882_v7 = vadd.f32 %v881_v60, %v2614_v32  ;;  %1029 = vrot.lane.b32.xlu1 %v928_v57, %s1908_s0  ;;  %v1657_v10 = vpop.f32.mrb[67].mxu1 }
 0x29f   :  { %v929_v16 = vmax.f32 %v882_v7, 0.0 }
 0x2a0   :  { %v886_v17 = vpop.f32.mrb[68].mxu1 }
 0x2a1   :  { %v887_v18 = vadd.f32 %v886_v17, %v2614_v32  ;;  %1033 = vrot.lane.b32.xlu1 %v929_v16, %s1909_s21  ;;  %v1660_v19 = vpop.f32.mrb[69].mxu1 }
 0x2a3   :  { %v930_v20 = vmax.f32 %v887_v18, 0.0 }
 0x2a4   :  { %v891_v21 = vpop.f32.mrb[70].mxu1 }
 0x2a5   :  { %v892_v23 = vadd.f32 %v891_v21, %v2614_v32  ;;  %1037 = vrot.lane.b32.xlu1 %v930_v20, %s1910_s26  ;;  %v1663_v25 = vpop.f32.mrb[71].mxu1 }
 0x2a7   :  { %v931_v26 = vmax.f32 %v892_v23, 0.0 }
 0x2a8   :  { %v896_v27 = vpop.f32.mrb[72].mxu1 }
 0x2a9   :  { %v897_v28 = vadd.f32 %v896_v27, %v2614_v32  ;;  %1041 = vrot.lane.b32.xlu1 %v931_v26, %s1911_s3  ;;  %v1666_v31 = vpop.f32.mrb[73].mxu1 }
 0x2ab   :  { %v932_v33 = vmax.f32 %v897_v28, 0.0 }
 0x2ac   :  { %v901_v34 = vpop.f32.mrb[74].mxu1 }
 0x2ad   :  { %v902_v35 = vadd.f32 %v901_v34, %v2614_v32  ;;  %1045 = vrot.lane.b32.xlu1 %v932_v33, %s1912_s9  ;;  %v1669_v36 = vpop.f32.mrb[75].mxu1  ;;  %v1173_v33 = vld [vmem:[%s2824_s5] sm:$0xff]  ;;  %v1174_v34 = vld [vmem:[%s2824_s5 + $0x8] sm:$0xff] }
 0x2ae   :  { %v1175_v36 = vld [vmem:[%s2824_s5 + $0x10] sm:$0xff] }
 0x2af   :  { %v933_v37 = vmax.f32 %v902_v35, 0.0  ;;  %v1816_v35 = vpack.c.bf16 %v1174_v34, %v1173_v33 }
 0x2b0   :  { %v906_v38 = vpop.f32.mrb[76].mxu1 }
 0x2b1   :  { %v907_v39 = vadd.f32 %v906_v38, %v2614_v32  ;;  %1049 = vrot.lane.b32.xlu1 %v933_v37, %s1913_s10  ;;  %v1672_v40 = vpop.f32.mrb[77].mxu1  ;;  %v1176_v37 = vld [vmem:[%s2824_s5 + $0x18] sm:$0xff] }
 0x2b2   :  { %v1819_v38 = vpack.c.bf16 %v1176_v37, %v1175_v36  ;;  %v1178_v40 = vld [vmem:[%s2824_s5 + $0x28] sm:$0x3] }
 0x2b3   :  { %v934_v41 = vmax.f32 %v907_v39, 0.0  ;;  %v1177_v39 = vld [vmem:[%s2824_s5 + $0x20] sm:$0xff] }
 0x2b5   :  { %1053 = vrot.lane.b32.xlu1 %v934_v41, %s1914_s15  ;;  %v1822_v41 = vpack.c.bf16 %v1178_v40, %v1177_v39 }
 0x2b9   :  { %1169 = vrot.lane.b32.xlu1 %v1167_v42, %s1910_s26  ;;  %v1091_v42 = vsub.s32 1, %v2596_v24 }
 0x2cb   :  { %v937_v43 = vpop.permute.xlu0 %936 }
 0x2cc   :  { %v996_v5 = vsel %vm995_vm4, %v910_v1, %v937_v43  ;;  %v1092_v43 = vrot.slane %v2608_v29, %v1091_v42 }
 0x2cf   :  { %v941_v44 = vpop.permute.xlu0 %940 }
 0x2d0   :  { %v998_v9 = vsel %vm997_vm5, %v996_v5, %v941_v44 }
 0x2d3   :  { %v945_v48 = vpop.permute.xlu1 %944 }
 0x2d4   :  { %v1000_v11 = vsel %vm999_vm6, %v998_v9, %v945_v48  ;;  %v1259_v48 = vld [vmem:[%s2825_s6 + $0x8] sm:$0xff] }
 0x2d7   :  { %v949_v50 = vpop.permute.xlu1 %948 }
 0x2d8   :  { %v1002_v30 = vsel %vm1001_vm7, %v1000_v11, %v949_v50 }
 0x2db   :  { %v953_v45 = vpop.permute.xlu0 %952 }
 0x2dc   :  { %v1004_v14 = vsel %vm1003_vm8, %v1002_v30, %v953_v45 }
 0x2df   :  { %v957_v51 = vpop.permute.xlu1 %956 }
 0x2e0   :  { %v1006_v32 = vsel %vm1005_vm9, %v1004_v14, %v957_v51 }
 0x2e3   :  { %v961_v46 = vpop.permute.xlu0 %960 }
 0x2e4   :  { %v1008_v57 = vsel %vm1007_vm10, %v1006_v32, %v961_v46 }
 0x2e7   :  { %v965_v47 = vpop.permute.xlu0 %964 }
 0x2e8   :  { %v1010_v63 = vsel %vm1009_vm11, %v1008_v57, %v965_v47  ;;  %v1258_v47 = vld [vmem:[%s2825_s6] sm:$0xff] }
 0x2e9   :  { %v1826_v50 = vpack.c.bf16 %v1259_v48, %v1258_v47 }
 0x2eb   :  { %v969_v49 = vpop.permute.xlu0 %968 }
 0x2ec   :  { %v1011_v7 = vsel %vm644_vm3, %v1010_v63, %v969_v49 }
 0x2ef   :  { %v973_v52 = vpop.permute.xlu0 %972 }
 0x2f0   :  { %v1013_v16 = vsel %vm1012_vm12, %v1011_v7, %v973_v52  ;;  %v1260_v52 = vld [vmem:[%s2825_s6 + $0x10] sm:$0xff] }
 0x2f3   :  { %v977_v54 = vpop.permute.xlu0 %976 }
 0x2f4   :  { %v1015_v18 = vsel %vm1014_vm13, %v1013_v16, %v977_v54 }
 0x2f7   :  { %v981_v58 = vpop.permute.xlu0 %980 }
 0x2f8   :  { %v1017_v20 = vsel %vm1016_vm14, %v1015_v18, %v981_v58  ;;  %v1263_v58 = vld [vmem:[%s2825_s6 + $0x28] sm:$0xff] }
 0x2fb   :  { %v985_v2 = vpop.permute.xlu0 %984 }
 0x2fc   :  { %v1019_v23 = vsel %vm1018_vm15, %v1017_v20, %v985_v2 }
 0x2ff   :  { %v989_v61 = vpop.permute.xlu0 %988 }
 0x300   :  { %v1021_v27 = vsel %vm1020_vm1, %v1019_v23, %v989_v61 }
 0x303   :  { %v993_v21 = vpop.permute.xlu0 %992 }
 0x304   :  { %v1023_v31 = vsel %vm1022_vm2, %v1021_v27, %v993_v21 }
 0x30b   :  { %v1026_v53 = vpop.permute.xlu1 %1025 }
 0x30c   :  { %v1056_v60 = vsel %vm995_vm4, %v926_v12, %v1026_v53  ;;  %vm1922_vm4 = vmmov 1   ;;  %v1261_v53 = vld [vmem:[%s2825_s6 + $0x18] sm:$0xff] }
 0x30f   :  { %v1030_v55 = vpop.permute.xlu1 %1029 }
 0x310   :  { %v1057_v3 = vsel %vm997_vm5, %v1056_v60, %v1030_v55  ;;  %v1829_v55 = vpack.c.bf16 %v1261_v53, %v1260_v52 }
 0x313   :  { %v1034_v56 = vpop.permute.xlu1 %1033 }
 0x314   :  { %v1058_v10 = vsel %vm999_vm6, %v1057_v3, %v1034_v56  ;;  %vm1179_vm6 = vcmask 343040   ;;  %v1262_v56 = vld [vmem:[%s2825_s6 + $0x20] sm:$0xff] }
 0x315   :  { %v1832_v59 = vpack.c.bf16 %v1263_v58, %v1262_v56 }
 0x317   :  { %v1038_v62 = vpop.permute.xlu1 %1037 }
 0x318   :  { %v1059_v17 = vsel %vm1001_vm7, %v1058_v10, %v1038_v62  ;;  %v1265_v62 = vld [vmem:[%s2825_s6 + $0x38] sm:$0xff] }
 0x31b   :  { %v1042_v8 = vpop.permute.xlu1 %1041 }
 0x31c   :  { %v1060_v19 = vsel %vm1003_vm8, %v1059_v17, %v1042_v8  ;;  %v1268_v8 = vsub.s32 2, %v2596_v24 }
 0x31e   :  { %v1269_v9 = vrot.slane %v2608_v29, %v1268_v8 }
 0x31f   :  { %v1046_v15 = vpop.permute.xlu1 %1045 }
 0x320   :  { %v1061_v22 = vsel %vm1005_vm9, %v1060_v19, %v1046_v15 }
 0x323   :  { %v1050_v13 = vpop.permute.xlu1 %1049 }
 0x324   :  { %v1062_v25 = vsel %vm1007_vm10, %v1061_v22, %v1050_v13 }
 0x327   :  { %v1054_v26 = vpop.permute.xlu1 %1053 }
 0x328   :  { %v1063_v28 = vsel %vm1009_vm11, %v1062_v25, %v1054_v26 }
 0x329   :  { %1399 = vmatprep.mubr.msk.f32.mxu1 %vm644_vm3, %v1063_v28  ;;  %vm1183_vm3 = vcmask 1041408  }
 0x32a   :  { %1161 = vmatmul.mubr.f32.vlgmr.msra.gmra.mrb[78].mxu1 %v1023_v31  ;;  %vm1823_vm5 = vmpackc.low %vm1183_vm3, %vm1922_vm4 }
 0x32b   :  { %1685 = vmatprep.mubr.msk.f32.mxu1 %vm1905_vm0, %v1906_v6  ;;  %1817 = vmatpush3.bf16.msra.mxu1 %v1816_v35  ;;  %v1170_v49 = vpop.permute.xlu1 %1169 }
 0x32c   :  { %1818 = vmatprep.subr.bf16.mxu1 %v1904_v0 }
 0x32f   :  { %1820 = vmatpush3.bf16.msra.mxu1 %v1819_v38 }
 0x330   :  { %1821 = vmatprep.subr.bf16.mxu1 %v1904_v0 }
 0x333   :  { %1824 = vmatpush3.bf16.msk.msra.mxu1 %vm1823_vm5, %v1822_v41 }
 0x334   :  { %1825 = vmatprep.subr.bf16.mxu1 %v1904_v0 }
 0x3fd   :  { %v1162_v44 = vpop.f32.mrb[78].mxu1 }
 0x3fe   :  { %v1163_v45 = vadd.f32 %v1162_v44, %v1092_v43  ;;  %v1164_v46 = vpop.f32.mrb[79].mxu1 }
 0x400   :  { %1902 = vtanh.f32 %v1163_v45 }
 0x40a   :  { %v1903_v51 = vpop.eup %1902 }
 0x40b   :  { %v1172_v54 = vsel %vm1001_vm7, %v1903_v51, %v1170_v49 }
 0x40c   :  { %1686 = vmatmul.mubr.msk.f32.vlgmr.msra.gmra.mrb[80].mxu1 %vm1179_vm6, %v1172_v54 }
 0x40d   :  { %1827 = vmatpush3.bf16.msra.mxu1 %v1826_v50  ;;  %1704 = vmatprep.mubr.msk.f32.mxu1 %vm1905_vm0, %v1906_v6  ;;  %v1264_v6 = vld [vmem:[%s2825_s6 + $0x30] sm:$0xff] }
 0x40e   :  { %1828 = vmatprep.subr.bf16.mxu1 %v1904_v0  ;;  %v1835_v1 = vpack.c.bf16 %v1265_v62, %v1264_v6 }
 0x411   :  { %1830 = vmatpush3.bf16.msra.mxu1 %v1829_v55 }
 0x412   :  { %1831 = vmatprep.subr.bf16.mxu1 %v1904_v0 }
 0x415   :  { %1833 = vmatpush3.bf16.msra.mxu1 %v1832_v59 }
 0x416   :  { %1834 = vmatprep.subr.bf16.mxu1 %v1904_v0 }
 0x419   :  { %1836 = vmatpush3.bf16.msra.mxu1 %v1835_v1 }
 0x4df   :  { %v1253_v2 = vpop.f32.mrb[80].mxu1 }
 0x4e0   :  { %v1257_v4 = vmax.f32 %v1253_v2, 0.0  ;;  %v1687_v5 = vpop.f32.mrb[81].mxu1 }
 0x4e2   :  { %1705 = vmatmul.mubr.msk.f32.vlgmr.msra.gmra.mrb[82].mxu1 %vm1009_vm11, %v1257_v4 }
 0x5b5   :  { %v1339_v0 = vpop.f32.mrb[82].mxu1 }
 0x5b6   :  { %v1340_v11 = vadd.f32 %v1339_v0, %v1269_v9  ;;  %v1706_v30 = vpop.f32.mrb[83].mxu1 }
 0x5b8   :  { %1343 = vst [vmem:[%s2826_s8] sm:$0xff] %v1340_v11 }

</bundles_post_ra>
